<compile_context>
chip_gen: v6e
topology: v6e:2x2x1
jax: 0.10.0
libtpu: 0.0.40
codegen_flags: <defaults>
</compile_context>

<pallas_src>
import functools
import math

import jax
import jax.numpy as jnp
from jax.experimental import pallas as pl
from jax.experimental.pallas import tpu as pltpu


_VMEM_LIMIT_BYTES = 48 * 1024 * 1024
_NEG_INF = -1e30   # bias padding value for padded vocab columns


def _round_up(x, m):
    return ((x + m - 1) // m) * m


# ----------------------------------------------------------------------------
# LSTM recurrence kernel: per grid step (b, t), run `chunk` timesteps of
#   g   = Wx_t + h @ W_hh^T            (Wx_t precomputed outside, biases folded)
#   i,f = sigmoid(g[:, :H]), sigmoid(g[:, H:2H])
#   gg  = tanh(g[:, 2H:3H]) ; o = sigmoid(g[:, 3H:4H])
#   c   = f*c + i*gg ; h = o*tanh(c)
# Gate order [i, f, g, o] matches torch.nn.LSTM.
# Grid = (batch_chunks [parallel], time_chunks [arbitrary/serial]).
# ----------------------------------------------------------------------------
def _lstm_chunk_kernel(wx_ref, r_ref, h0_ref, c0_ref,
                       out_ref, hN_ref, cN_ref,
                       h_sc, c_sc, *, hidden_size, chunk, seq_len):
    t = pl.program_id(1)
    nt = pl.num_programs(1)

    @pl.when(t == 0)
    def _():
        h_sc[...] = h0_ref[...].astype(jnp.float32)
        c_sc[...] = c0_ref[...].astype(jnp.float32)

    H = hidden_size
    r = r_ref[...]                                   # (H, 4H) bf16, resident

    def run(masked):
        def step(i, carry):
            h, c = carry
            wx = wx_ref[i].astype(jnp.float32)       # (Bc, 4H), biases folded
            g = wx + jnp.dot(h.astype(r.dtype), r,
                             preferred_element_type=jnp.float32)
            # TODO(synk): for H that is a multiple of 128 these slices are
            # lane-tile aligned; for other H they cost an XLU relayout.
            i_g = jax.nn.sigmoid(g[:, 0:H])
            f_g = jax.nn.sigmoid(g[:, H:2 * H])
            c_g = jnp.tanh(g[:, 2 * H:3 * H])
            o_g = jax.nn.sigmoid(g[:, 3 * H:4 * H])
            c_new = f_g * c + i_g * c_g
            h_new = o_g * jnp.tanh(c_new)
            if masked:   # only traced for the (statically known) partial chunk
                valid = (t * chunk + i) < seq_len
                h_new = jnp.where(valid, h_new, h)
                c_new = jnp.where(valid, c_new, c)
            out_ref[i] = h_new.astype(out_ref.dtype)
            return (h_new, c_new)

        h, c = jax.lax.fori_loop(0, chunk, step, (h_sc[...], c_sc[...]),
                                 unroll=True)
        h_sc[...] = h
        c_sc[...] = c

    if seq_len % chunk == 0:          # static: no partial chunk anywhere
        run(masked=False)
    else:
        @pl.when(t < nt - 1)
        def _():
            run(masked=False)

        @pl.when(t == nt - 1)
        def _():
            run(masked=True)

    @pl.when(t == nt - 1)
    def _():
        hN_ref[...] = h_sc[...].astype(hN_ref.dtype)
        cN_ref[...] = c_sc[...].astype(cN_ref.dtype)


def _lstm_layer_pallas(wx, w_hh_t, h0, c0, *, seq_len, time_chunk,
                       batch_chunk=None):
    """One LSTM layer. wx: (T, Bp, 4H) precomputed input projection (+biases),
    typically bf16. w_hh_t: (H, 4H) (bf16). h0/c0: (Bp, H) f32."""
    T, Bp, H4 = wx.shape
    H = H4 // 4

    tc = max(1, min(time_chunk, T))
    T_pad = _round_up(T, tc)
    if T_pad != T:
        wx = jnp.pad(wx, ((0, T_pad - T), (0, 0), (0, 0)))
    nt = T_pad // tc

    if batch_chunk is None:
        bc = Bp
    else:
        bc = min(_round_up(batch_chunk, 8), Bp)
        if Bp % bc != 0:
            bc = Bp
    nb = Bp // bc

    kern = functools.partial(_lstm_chunk_kernel, hidden_size=H, chunk=tc,
                             seq_len=seq_len)

    wx_isz = jnp.dtype(wx.dtype).itemsize
    w_isz = jnp.dtype(w_hh_t.dtype).itemsize
    flops = 2 * T_pad * Bp * H * H4 + 12 * T_pad * Bp * H4
    transcendentals = 5 * T_pad * Bp * H
    bytes_accessed = (wx_isz * T_pad * Bp * H4 + w_isz * H * H4
                      + wx_isz * T_pad * Bp * H + 4 * 4 * Bp * H)

    def build(single_buffer):
        sb = dict(pipeline_mode=pl.Buffered(1)) if single_buffer else {}
        return pl.pallas_call(
            kern,
            out_shape=(
                jax.ShapeDtypeStruct((T_pad, Bp, H), wx.dtype),   # hidden seq
                jax.ShapeDtypeStruct((Bp, H), jnp.float32),       # h_n
                jax.ShapeDtypeStruct((Bp, H), jnp.float32),       # c_n
            ),
            grid_spec=pltpu.PrefetchScalarGridSpec(
                num_scalar_prefetch=0,
                grid=(nb, nt),
                in_specs=[
                    pl.BlockSpec((tc, bc, H4), lambda b, t: (t, b, 0)),  # Wx
                    pl.BlockSpec((H, H4), lambda b, t: (0, 0), **sb),    # W_hh^T
                    pl.BlockSpec((bc, H), lambda b, t: (b, 0), **sb),    # h0
                    pl.BlockSpec((bc, H), lambda b, t: (b, 0), **sb),    # c0
                ],
                out_specs=[
                    pl.BlockSpec((tc, bc, H), lambda b, t: (t, b, 0)),
                    pl.BlockSpec((bc, H), lambda b, t: (b, 0)),
                    pl.BlockSpec((bc, H), lambda b, t: (b, 0)),
                ],
                scratch_shapes=[pltpu.VMEM((bc, H), jnp.float32),   # h carry
                                pltpu.VMEM((bc, H), jnp.float32)],  # c carry
            ),
            compiler_params=pltpu.CompilerParams(
                dimension_semantics=("parallel", "arbitrary"),
                vmem_limit_bytes=_VMEM_LIMIT_BYTES),
            cost_estimate=pl.CostEstimate(flops=flops,
                                          transcendentals=transcendentals,
                                          bytes_accessed=bytes_accessed),
        )

    try:
        out, hN, cN = build(True)(wx, w_hh_t, h0, c0)
    except Exception:
        # Fallback if pipeline_mode=Buffered(1) is unsupported in this JAX.
        out, hN, cN = build(False)(wx, w_hh_t, h0, c0)
    return out[:seq_len], hN, cN


# ----------------------------------------------------------------------------
# Output head: log_softmax(x @ W_out^T + b), vocab-tiled.
#   pass 1: online logsumexp over vocab tiles  -> lse (rows, 1)
#   pass 2: parallel over (row, vocab) tiles   -> z - lse  (lane-dense blocks)
# ----------------------------------------------------------------------------
def _head_lse_kernel(x_ref, w_ref, b_ref, lse_ref, m_sc, l_sc):
    j = pl.program_id(1)

    @pl.when(j == 0)
    def _():
        m_sc[...] = jnp.full_like(m_sc, -jnp.inf)
        l_sc[...] = jnp.zeros_like(l_sc)

    z = jnp.dot(x_ref[...], w_ref[...], preferred_element_type=jnp.float32)
    z = z + b_ref[...].astype(jnp.float32)
    m_prev = m_sc[...]
    m_new = jnp.maximum(m_prev, jnp.max(z, axis=-1, keepdims=True))
    l_sc[...] = (l_sc[...] * jnp.exp(m_prev - m_new)
                 + jnp.sum(jnp.exp(z - m_new), axis=-1, keepdims=True))
    m_sc[...] = m_new

    @pl.when(j == pl.num_programs(1) - 1)
    def _():
        lse_ref[...] = m_sc[...] + jnp.log(l_sc[...])


def _head_out_kernel(x_ref, w_ref, b_ref, lse_ref, o_ref):
    z = jnp.dot(x_ref[...], w_ref[...], preferred_element_type=jnp.float32)
    z = z + b_ref[...].astype(jnp.float32)
    o_ref[...] = (z - lse_ref[...]).astype(o_ref.dtype)


def _head_pallas(x, w_t, b, *, row_tile=256, vocab_tile=512):
    """x: (N, H) (bf16), w_t: (H, V) (bf16), b: (V,) f32 -> log-probs (N, V) f32."""
    N, H = x.shape
    V = w_t.shape[1]

    # Rows: pad to a multiple of the (sublane-aligned) row tile.
    tn = min(row_tile, _round_up(N, 8))
    N_pad = _round_up(N, tn)
    if N_pad != N:
        x = jnp.pad(x, ((0, N_pad - N), (0, 0)))

    # Vocab: lane-dense tiles; padded columns get bias=-1e30 so they vanish.
    if V <= vocab_tile:
        vt, V_pad = V, V
    else:
        vt = vocab_tile
        V_pad = _round_up(V, vt)
    if V_pad != V:
        w_t = jnp.pad(w_t, ((0, 0), (0, V_pad - V)))
        b = jnp.pad(b, (0, V_pad - V), constant_values=_NEG_INF)
    b2 = b.reshape(1, V_pad).astype(jnp.float32)

    nr, nv = N_pad // tn, V_pad // vt

    def build(single_buffer):
        sb = dict(pipeline_mode=pl.Buffered(1)) if single_buffer else {}
        lse_call = pl.pallas_call(
            _head_lse_kernel,
            out_shape=jax.ShapeDtypeStruct((N_pad, 1), jnp.float32),
            grid_spec=pltpu.PrefetchScalarGridSpec(
                num_scalar_prefetch=0,
                grid=(nr, nv),
                in_specs=[
                    pl.BlockSpec((tn, H), lambda i, j: (i, 0), **sb),
                    pl.BlockSpec((H, vt), lambda i, j: (0, j)),
                    pl.BlockSpec((1, vt), lambda i, j: (0, j)),
                ],
                out_specs=pl.BlockSpec((tn, 1), lambda i, j: (i, 0)),
                scratch_shapes=[pltpu.VMEM((tn, 1), jnp.float32),
                                pltpu.VMEM((tn, 1), jnp.float32)],
            ),
            compiler_params=pltpu.CompilerParams(
                dimension_semantics=("parallel", "arbitrary"),
                vmem_limit_bytes=_VMEM_LIMIT_BYTES),
        )
        out_call = pl.pallas_call(
            _head_out_kernel,
            out_shape=jax.ShapeDtypeStruct((N_pad, V_pad), jnp.float32),
            grid_spec=pltpu.PrefetchScalarGridSpec(
                num_scalar_prefetch=0,
                grid=(nr, nv),
                in_specs=[
                    pl.BlockSpec((tn, H), lambda i, j: (i, 0), **sb),
                    pl.BlockSpec((H, vt), lambda i, j: (0, j)),
                    pl.BlockSpec((1, vt), lambda i, j: (0, j)),
                    pl.BlockSpec((tn, 1), lambda i, j: (i, 0), **sb),
                ],
                out_specs=pl.BlockSpec((tn, vt), lambda i, j: (i, j)),
            ),
            compiler_params=pltpu.CompilerParams(
                dimension_semantics=("parallel", "parallel"),
                vmem_limit_bytes=_VMEM_LIMIT_BYTES),
        )
        return lse_call, out_call

    try:
        lse_call, out_call = build(True)
        lse = lse_call(x, w_t, b2)
        out = out_call(x, w_t, b2, lse)
    except Exception:
        lse_call, out_call = build(False)
        lse = lse_call(x, w_t, b2)
        out = out_call(x, w_t, b2, lse)
    return out[:N, :V]


# ----------------------------------------------------------------------------
# Full LM forward (matches the PyTorch module's forward at inference).
# ----------------------------------------------------------------------------
def lm_forward(tokens, params, state=None, *, time_chunk=16, batch_chunk=None,
               compute_dtype=jnp.bfloat16):
    """tokens: (B, T) int32. Returns (log_probs (B,T,V) f32, (h_n, c_n) f32)."""
    embed = params["embed"]                       # (V, E), row 0 == 0 (padding_idx)
    lstm_layers = params["lstm"]                  # [(W_ih^T, W_hh^T, b_folded), ...]
    w_out_t, b_out = params["head"]               # (H, V), (V,)

    B, T = tokens.shape
    H = lstm_layers[0][1].shape[0]
    L = len(lstm_layers)
    V = w_out_t.shape[1]

    Bp = _round_up(B, 8)                          # sublane-aligned batch

    # Embedding gather (XLA) and to time-major for the recurrence.
    x = embed[tokens]                             # (B, T, E)
    x = jnp.transpose(x, (1, 0, 2))               # (T, B, E)
    if Bp != B:
        x = jnp.pad(x, ((0, 0), (0, Bp - B), (0, 0)))

    if state is None:
        h_prev = jnp.zeros((L, Bp, H), jnp.float32)
        c_prev = jnp.zeros((L, Bp, H), jnp.float32)
    else:
        h_prev, c_prev = state
        h_prev = h_prev.astype(jnp.float32)
        c_prev = c_prev.astype(jnp.float32)
        if Bp != B:
            h_prev = jnp.pad(h_prev, ((0, 0), (0, Bp - B), (0, 0)))
            c_prev = jnp.pad(c_prev, ((0, 0), (0, Bp - B), (0, 0)))

    h_out, c_out = [], []
    inp = x
    for l, (w_ih_t, w_hh_t, b) in enumerate(lstm_layers):
        # Hoisted input projection: one big bf16 matmul over all T*Bp rows,
        # f32 accumulate, both LSTM biases folded in; stream wx in bf16.
        wx = jnp.einsum("tbi,ih->tbh",
                        inp.astype(compute_dtype),
                        w_ih_t.astype(compute_dtype),
                        preferred_element_type=jnp.float32) + b
        wx = wx.astype(compute_dtype)
        seq, hN, cN = _lstm_layer_pallas(
            wx, w_hh_t.astype(compute_dtype), h_prev[l], c_prev[l],
            seq_len=T, time_chunk=time_chunk, batch_chunk=batch_chunk)
        inp = seq
        h_out.append(hN)
        c_out.append(cN)

    # TODO(synk): nn.Dropout(p=0.2) is identity here (inference/eval semantics).
    y = inp.reshape(T * Bp, H)
    logp = _head_pallas(y, w_out_t.astype(compute_dtype), b_out)
    logp = logp.reshape(T, Bp, V)[:, :B].transpose(1, 0, 2)      # (B, T, V)

    h_n = jnp.stack(h_out)[:, :B]
    c_n = jnp.stack(c_out)[:, :B]
    return logp, (h_n, c_n)


# ----------------------------------------------------------------------------
# Deterministic parameter init (PyTorch-like) and a pure-JAX reference that
# performs the same bf16 casts as the kernel path (for tight comparison).
# ----------------------------------------------------------------------------
def init_lm_params(key, vocab_sz, embed_sz, hidden_sz, num_layers,
                   dtype=jnp.float32):
    n_keys = 2 + 4 * num_layers + 2
    keys = jax.random.split(key, n_keys)
    ki = iter(range(n_keys))

    embed = jax.random.normal(keys[next(ki)], (vocab_sz, embed_sz), dtype)
    embed = embed.at[0].set(0.0)                  # padding_idx=0 row is zeros

    bound = 1.0 / math.sqrt(hidden_sz)
    lstm = []
    in_sz = embed_sz
    for _ in range(num_layers):
        w_ih = jax.random.uniform(keys[next(ki)], (4 * hidden_sz, in_sz), dtype,
                                  minval=-bound, maxval=bound)
        w_hh = jax.random.uniform(keys[next(ki)], (4 * hidden_sz, hidden_sz),
                                  dtype, minval=-bound, maxval=bound)
        b_ih = jax.random.uniform(keys[next(ki)], (4 * hidden_sz,), dtype,
                                  minval=-bound, maxval=bound)
        b_hh = jax.random.uniform(keys[next(ki)], (4 * hidden_sz,), dtype,
                                  minval=-bound, maxval=bound)
        # Transposed weights + folded bias (both LSTM biases are plain adds).
        lstm.append((w_ih.T, w_hh.T, b_ih + b_hh))
        in_sz = hidden_sz

    if embed_sz == hidden_sz:
        w_out_t = embed.T                         # weight tying, as in LM
        _ = keys[next(ki)]
    else:
        w_out_t = jax.random.uniform(keys[next(ki)], (hidden_sz, vocab_sz),
                                     dtype, minval=-bound, maxval=bound)
    b_out = jax.random.uniform(keys[next(ki)], (vocab_sz,), dtype,
                               minval=-bound, maxval=bound)

    return {"embed": embed, "lstm": lstm, "head": (w_out_t, b_out)}


def lm_reference(tokens, params, compute_dtype=jnp.bfloat16):
    embed = params["embed"]
    w_out_t, b_out = params["head"]
    B, T = tokens.shape
    x = jnp.transpose(embed[tokens], (1, 0, 2))   # (T, B, E)

    inp = x
    h_list, c_list = [], []
    for (w_ih_t, w_hh_t, b) in params["lstm"]:
        H = w_hh_t.shape[0]
        wx = jnp.einsum("tbi,ih->tbh",
                        inp.astype(compute_dtype),
                        w_ih_t.astype(compute_dtype),
                        preferred_element_type=jnp.float32) + b
        wx = wx.astype(compute_dtype)
        r = w_hh_t.astype(compute_dtype)

        def step(carry, wx_t, r=r, H=H):
            h, c = carry
            g = wx_t.astype(jnp.float32) + jnp.dot(
                h.astype(r.dtype), r, preferred_element_type=jnp.float32)
            i = jax.nn.sigmoid(g[:, 0:H])
            f = jax.nn.sigmoid(g[:, H:2 * H])
            gg = jnp.tanh(g[:, 2 * H:3 * H])
            o = jax.nn.sigmoid(g[:, 3 * H:4 * H])
            c2 = f * c + i * gg
            h2 = o * jnp.tanh(c2)
            return (h2, c2), h2.astype(compute_dtype)

        h0 = jnp.zeros((B, H), jnp.float32)
        c0 = jnp.zeros((B, H), jnp.float32)
        (hN, cN), hs = jax.lax.scan(step, (h0, c0), wx)
        inp = hs
        h_list.append(hN)
        c_list.append(cN)

    y = inp.reshape(T * B, -1)
    z = jnp.dot(y, w_out_t.astype(compute_dtype),
                preferred_element_type=jnp.float32) + b_out
    logp = jax.nn.log_softmax(z, axis=-1)
    logp = logp.reshape(T, B, -1).transpose(1, 0, 2)
    return logp, (jnp.stack(h_list), jnp.stack(c_list))


if __name__ == "__main__":
    vocab_sz, embed_sz, hidden_sz, num_layers = 32, 32, 32, 2
    B, T = 2, 8

    key = jax.random.PRNGKey(0)
    k_tok, k_par = jax.random.split(key)
    tokens = jax.random.randint(k_tok, (B, T), 0, vocab_sz, dtype=jnp.int32)
    params = init_lm_params(k_par, vocab_sz, embed_sz, hidden_sz, num_layers)

    ref_logp, (ref_h, ref_c) = lm_reference(tokens, params)

    # Default config (single full time chunk).
    logp, (h_n, c_n) = lm_forward(tokens, params)
    logp = jax.block_until_ready(logp)
    h_n = jax.block_until_ready(h_n)
    c_n = jax.block_until_ready(c_n)

    assert logp.shape == (B, T, vocab_sz)
    assert h_n.shape == (num_layers, B, hidden_sz)
    assert c_n.shape == (num_layers, B, hidden_sz)
    tol = dict(atol=1e-2, rtol=1e-2)
    assert jnp.allclose(logp, ref_logp, **tol), \
        float(jnp.max(jnp.abs(logp - ref_logp)))
    assert jnp.allclose(h_n, ref_h, **tol)
    assert jnp.allclose(c_n, ref_c, **tol)

    # Also exercise the multi-chunk + masked-last-chunk path (T % tc != 0).
    logp2, (h_n2, c_n2) = lm_forward(tokens, params, time_chunk=3)
    logp2 = jax.block_until_ready(logp2)
    assert jnp.allclose(logp2, ref_logp, **tol), \
        float(jnp.max(jnp.abs(logp2 - ref_logp)))
    assert jnp.allclose(h_n2, ref_h, **tol)
    assert jnp.allclose(c_n2, ref_c, **tol)

    print("KERNEL_OK")
</pallas_src>

<mosaic_0001>
module attributes {stable_mosaic.version = 11 : i64} {
  func.func @_lstm_chunk_kernel(%arg0: i32, %arg1: i32, %arg2: memref<8x8x128xbf16, #tpu.memory_space<vmem>>, %arg3: memref<32x128xbf16, #tpu.memory_space<vmem>>, %arg4: memref<8x32xf32, #tpu.memory_space<vmem>>, %arg5: memref<8x32xf32, #tpu.memory_space<vmem>>, %arg6: memref<8x8x32xbf16, #tpu.memory_space<vmem>>, %arg7: memref<8x32xf32, #tpu.memory_space<vmem>>, %arg8: memref<8x32xf32, #tpu.memory_space<vmem>>, %arg9: memref<8x32xf32, #tpu.memory_space<vmem>>, %arg10: memref<8x32xf32, #tpu.memory_space<vmem>>) attributes {dimension_semantics = [#tpu.dimension_semantics<parallel>, #tpu.dimension_semantics<arbitrary>], iteration_bounds = array<i64: 1, 1>, scalar_prefetch = 0 : i64, scratch_operands = 2 : i64, tpu.core_type = #tpu.core_type<tc>, window_params = [{transform_indices = @transform_0, window_bounds = array<i64: 8, 8, 128>}, {pipeline_mode = #tpu.pipeline_mode<synchronous>, transform_indices = @transform_1, window_bounds = array<i64: 32, 128>}, {pipeline_mode = #tpu.pipeline_mode<synchronous>, transform_indices = @transform_2, window_bounds = array<i64: 8, 32>}, {pipeline_mode = #tpu.pipeline_mode<synchronous>, transform_indices = @transform_3, window_bounds = array<i64: 8, 32>}, {transform_indices = @transform_4, window_bounds = array<i64: 8, 8, 32>}, {transform_indices = @transform_5, window_bounds = array<i64: 8, 32>}, {transform_indices = @transform_6, window_bounds = array<i64: 8, 32>}]} {
    %c0_i32 = arith.constant 0 : i32
    %0 = arith.cmpi eq, %arg1, %c0_i32 : i32
    %1 = arith.extui %0 : i1 to i32
    %c0_i32_0 = arith.constant 0 : i32
    %2 = arith.cmpi ne, %1, %c0_i32_0 : i32
    scf.if %2 {
      %c0_76 = arith.constant 0 : index
      %c0_77 = arith.constant 0 : index
      %307 = vector.load %arg4[%c0_76, %c0_77] : memref<8x32xf32, #tpu.memory_space<vmem>>, vector<8x32xf32>
      %c0_78 = arith.constant 0 : index
      %c0_79 = arith.constant 0 : index
      %308 = vector.load %arg9[%c0_78, %c0_79] : memref<8x32xf32, #tpu.memory_space<vmem>>, vector<8x32xf32>
      tpu.vector_store %arg9[%c0_78, %c0_79], %307 {strides = array<i32>} : memref<8x32xf32, #tpu.memory_space<vmem>>, vector<8x32xf32>,
      %c0_80 = arith.constant 0 : index
      %c0_81 = arith.constant 0 : index
      %309 = vector.load %arg5[%c0_80, %c0_81] : memref<8x32xf32, #tpu.memory_space<vmem>>, vector<8x32xf32>
      %c0_82 = arith.constant 0 : index
      %c0_83 = arith.constant 0 : index
      %310 = vector.load %arg10[%c0_82, %c0_83] : memref<8x32xf32, #tpu.memory_space<vmem>>, vector<8x32xf32>
      tpu.vector_store %arg10[%c0_82, %c0_83], %309 {strides = array<i32>} : memref<8x32xf32, #tpu.memory_space<vmem>>, vector<8x32xf32>,
    } else {
    }
    %c0 = arith.constant 0 : index
    %c0_1 = arith.constant 0 : index
    %3 = vector.load %arg3[%c0, %c0_1] : memref<32x128xbf16, #tpu.memory_space<vmem>>, vector<32x128xbf16>
    %c0_2 = arith.constant 0 : index
    %c0_3 = arith.constant 0 : index
    %4 = vector.load %arg9[%c0_2, %c0_3] : memref<8x32xf32, #tpu.memory_space<vmem>>, vector<8x32xf32>
    %c0_4 = arith.constant 0 : index
    %c0_5 = arith.constant 0 : index
    %5 = vector.load %arg10[%c0_4, %c0_5] : memref<8x32xf32, #tpu.memory_space<vmem>>, vector<8x32xf32>
    %c0_i32_6 = arith.constant 0 : i32
    %6 = arith.index_cast %c0_i32_6 : i32 to index
    %c0_7 = arith.constant 0 : index
    %c0_8 = arith.constant 0 : index
    %7 = vector.load %arg2[%6, %c0_7, %c0_8] : memref<8x8x128xbf16, #tpu.memory_space<vmem>>, vector<1x8x128xbf16>
    %8 = vector.shape_cast %7 : vector<1x8x128xbf16> to vector<8x128xbf16>
    %9 = arith.extf %8 : vector<8x128xbf16> to vector<8x128xf32>
    %10 = arith.truncf %4 : vector<8x32xf32> to vector<8x32xbf16>
    %cst = arith.constant dense<0.000000e+00> : vector<8x128xf32>
    %11 = tpu.matmul %10, %3, %cst {dimension_numbers = #tpu.dot_dimension_numbers<[1], [0], [0], [1], [0, 0, 1, 1], [], []>} : vector<8x32xbf16>, vector<32x128xbf16>, vector<8x128xf32> -> vector<8x128xf32>
    %12 = arith.addf %9, %11 : vector<8x128xf32>
    %13 = vector.extract_strided_slice %12 {offsets = [0, 0], sizes = [8, 32], strides = [1, 1]} : vector<8x128xf32> to vector<8x32xf32>
    %14 = arith.negf %13 : vector<8x32xf32>
    %15 = math.exp %14 : vector<8x32xf32>
    %cst_9 = arith.constant 1.000000e+00 : f32
    %16 = vector.broadcast %cst_9 : f32 to vector<8x32xf32>
    %17 = arith.addf %16, %15 : vector<8x32xf32>
    %18 = arith.divf %16, %17 : vector<8x32xf32>
    %19 = vector.extract_strided_slice %12 {offsets = [0, 32], sizes = [8, 32], strides = [1, 1]} : vector<8x128xf32> to vector<8x32xf32>
    %20 = arith.negf %19 : vector<8x32xf32>
    %21 = math.exp %20 : vector<8x32xf32>
    %cst_10 = arith.constant 1.000000e+00 : f32
    %22 = vector.broadcast %cst_10 : f32 to vector<8x32xf32>
    %23 = arith.addf %22, %21 : vector<8x32xf32>
    %24 = arith.divf %22, %23 : vector<8x32xf32>
    %25 = vector.extract_strided_slice %12 {offsets = [0, 64], sizes = [8, 32], strides = [1, 1]} : vector<8x128xf32> to vector<8x32xf32>
    %26 = math.tanh %25 : vector<8x32xf32>
    %27 = vector.extract_strided_slice %12 {offsets = [0, 96], sizes = [8, 32], strides = [1, 1]} : vector<8x128xf32> to vector<8x32xf32>
    %28 = arith.negf %27 : vector<8x32xf32>
    %29 = math.exp %28 : vector<8x32xf32>
    %cst_11 = arith.constant 1.000000e+00 : f32
    %30 = vector.broadcast %cst_11 : f32 to vector<8x32xf32>
    %31 = arith.addf %30, %29 : vector<8x32xf32>
    %32 = arith.divf %30, %31 : vector<8x32xf32>
    %33 = arith.mulf %24, %5 : vector<8x32xf32>
    %34 = arith.mulf %18, %26 : vector<8x32xf32>
    %35 = arith.addf %33, %34 : vector<8x32xf32>
    %36 = math.tanh %35 : vector<8x32xf32>
    %37 = arith.mulf %32, %36 : vector<8x32xf32>
    %38 = arith.truncf %37 : vector<8x32xf32> to vector<8x32xbf16>
    %39 = arith.index_cast %c0_i32_6 : i32 to index
    %c0_12 = arith.constant 0 : index
    %c0_13 = arith.constant 0 : index
    %40 = vector.load %arg6[%39, %c0_12, %c0_13] : memref<8x8x32xbf16, #tpu.memory_space<vmem>>, vector<1x8x32xbf16>
    %41 = vector.shape_cast %40 : vector<1x8x32xbf16> to vector<8x32xbf16>
    %42 = vector.shape_cast %38 : vector<8x32xbf16> to vector<1x8x32xbf16>
    tpu.vector_store %arg6[%39, %c0_12, %c0_13], %42 {strides = array<i32>} : memref<8x8x32xbf16, #tpu.memory_space<vmem>>, vector<1x8x32xbf16>,
    %c1_i32 = arith.constant 1 : i32
    %43 = arith.index_cast %c1_i32 : i32 to index
    %c0_14 = arith.constant 0 : index
    %c0_15 = arith.constant 0 : index
    %44 = vector.load %arg2[%43, %c0_14, %c0_15] : memref<8x8x128xbf16, #tpu.memory_space<vmem>>, vector<1x8x128xbf16>
    %45 = vector.shape_cast %44 : vector<1x8x128xbf16> to vector<8x128xbf16>
    %46 = arith.extf %45 : vector<8x128xbf16> to vector<8x128xf32>
    %47 = arith.truncf %37 : vector<8x32xf32> to vector<8x32xbf16>
    %cst_16 = arith.constant dense<0.000000e+00> : vector<8x128xf32>
    %48 = tpu.matmul %47, %3, %cst_16 {dimension_numbers = #tpu.dot_dimension_numbers<[1], [0], [0], [1], [0, 0, 1, 1], [], []>} : vector<8x32xbf16>, vector<32x128xbf16>, vector<8x128xf32> -> vector<8x128xf32>
    %49 = arith.addf %46, %48 : vector<8x128xf32>
    %50 = vector.extract_strided_slice %49 {offsets = [0, 0], sizes = [8, 32], strides = [1, 1]} : vector<8x128xf32> to vector<8x32xf32>
    %51 = arith.negf %50 : vector<8x32xf32>
    %52 = math.exp %51 : vector<8x32xf32>
    %cst_17 = arith.constant 1.000000e+00 : f32
    %53 = vector.broadcast %cst_17 : f32 to vector<8x32xf32>
    %54 = arith.addf %53, %52 : vector<8x32xf32>
    %55 = arith.divf %53, %54 : vector<8x32xf32>
    %56 = vector.extract_strided_slice %49 {offsets = [0, 32], sizes = [8, 32], strides = [1, 1]} : vector<8x128xf32> to vector<8x32xf32>
    %57 = arith.negf %56 : vector<8x32xf32>
    %58 = math.exp %57 : vector<8x32xf32>
    %cst_18 = arith.constant 1.000000e+00 : f32
    %59 = vector.broadcast %cst_18 : f32 to vector<8x32xf32>
    %60 = arith.addf %59, %58 : vector<8x32xf32>
    %61 = arith.divf %59, %60 : vector<8x32xf32>
    %62 = vector.extract_strided_slice %49 {offsets = [0, 64], sizes = [8, 32], strides = [1, 1]} : vector<8x128xf32> to vector<8x32xf32>
    %63 = math.tanh %62 : vector<8x32xf32>
    %64 = vector.extract_strided_slice %49 {offsets = [0, 96], sizes = [8, 32], strides = [1, 1]} : vector<8x128xf32> to vector<8x32xf32>
    %65 = arith.negf %64 : vector<8x32xf32>
    %66 = math.exp %65 : vector<8x32xf32>
    %cst_19 = arith.constant 1.000000e+00 : f32
    %67 = vector.broadcast %cst_19 : f32 to vector<8x32xf32>
    %68 = arith.addf %67, %66 : vector<8x32xf32>
    %69 = arith.divf %67, %68 : vector<8x32xf32>
    %70 = arith.mulf %61, %35 : vector<8x32xf32>
    %71 = arith.mulf %55, %63 : vector<8x32xf32>
    %72 = arith.addf %70, %71 : vector<8x32xf32>
    %73 = math.tanh %72 : vector<8x32xf32>
    %74 = arith.mulf %69, %73 : vector<8x32xf32>
    %75 = arith.truncf %74 : vector<8x32xf32> to vector<8x32xbf16>
    %76 = arith.index_cast %c1_i32 : i32 to index
    %c0_20 = arith.constant 0 : index
    %c0_21 = arith.constant 0 : index
    %77 = vector.load %arg6[%76, %c0_20, %c0_21] : memref<8x8x32xbf16, #tpu.memory_space<vmem>>, vector<1x8x32xbf16>
    %78 = vector.shape_cast %77 : vector<1x8x32xbf16> to vector<8x32xbf16>
    %79 = vector.shape_cast %75 : vector<8x32xbf16> to vector<1x8x32xbf16>
    tpu.vector_store %arg6[%76, %c0_20, %c0_21], %79 {strides = array<i32>} : memref<8x8x32xbf16, #tpu.memory_space<vmem>>, vector<1x8x32xbf16>,
    %c2_i32 = arith.constant 2 : i32
    %80 = arith.index_cast %c2_i32 : i32 to index
    %c0_22 = arith.constant 0 : index
    %c0_23 = arith.constant 0 : index
    %81 = vector.load %arg2[%80, %c0_22, %c0_23] : memref<8x8x128xbf16, #tpu.memory_space<vmem>>, vector<1x8x128xbf16>
    %82 = vector.shape_cast %81 : vector<1x8x128xbf16> to vector<8x128xbf16>
    %83 = arith.extf %82 : vector<8x128xbf16> to vector<8x128xf32>
    %84 = arith.truncf %74 : vector<8x32xf32> to vector<8x32xbf16>
    %cst_24 = arith.constant dense<0.000000e+00> : vector<8x128xf32>
    %85 = tpu.matmul %84, %3, %cst_24 {dimension_numbers = #tpu.dot_dimension_numbers<[1], [0], [0], [1], [0, 0, 1, 1], [], []>} : vector<8x32xbf16>, vector<32x128xbf16>, vector<8x128xf32> -> vector<8x128xf32>
    %86 = arith.addf %83, %85 : vector<8x128xf32>
    %87 = vector.extract_strided_slice %86 {offsets = [0, 0], sizes = [8, 32], strides = [1, 1]} : vector<8x128xf32> to vector<8x32xf32>
    %88 = arith.negf %87 : vector<8x32xf32>
    %89 = math.exp %88 : vector<8x32xf32>
    %cst_25 = arith.constant 1.000000e+00 : f32
    %90 = vector.broadcast %cst_25 : f32 to vector<8x32xf32>
    %91 = arith.addf %90, %89 : vector<8x32xf32>
    %92 = arith.divf %90, %91 : vector<8x32xf32>
    %93 = vector.extract_strided_slice %86 {offsets = [0, 32], sizes = [8, 32], strides = [1, 1]} : vector<8x128xf32> to vector<8x32xf32>
    %94 = arith.negf %93 : vector<8x32xf32>
    %95 = math.exp %94 : vector<8x32xf32>
    %cst_26 = arith.constant 1.000000e+00 : f32
    %96 = vector.broadcast %cst_26 : f32 to vector<8x32xf32>
    %97 = arith.addf %96, %95 : vector<8x32xf32>
    %98 = arith.divf %96, %97 : vector<8x32xf32>
    %99 = vector.extract_strided_slice %86 {offsets = [0, 64], sizes = [8, 32], strides = [1, 1]} : vector<8x128xf32> to vector<8x32xf32>
    %100 = math.tanh %99 : vector<8x32xf32>
    %101 = vector.extract_strided_slice %86 {offsets = [0, 96], sizes = [8, 32], strides = [1, 1]} : vector<8x128xf32> to vector<8x32xf32>
    %102 = arith.negf %101 : vector<8x32xf32>
    %103 = math.exp %102 : vector<8x32xf32>
    %cst_27 = arith.constant 1.000000e+00 : f32
    %104 = vector.broadcast %cst_27 : f32 to vector<8x32xf32>
    %105 = arith.addf %104, %103 : vector<8x32xf32>
    %106 = arith.divf %104, %105 : vector<8x32xf32>
    %107 = arith.mulf %98, %72 : vector<8x32xf32>
    %108 = arith.mulf %92, %100 : vector<8x32xf32>
    %109 = arith.addf %107, %108 : vector<8x32xf32>
    %110 = math.tanh %109 : vector<8x32xf32>
    %111 = arith.mulf %106, %110 : vector<8x32xf32>
    %112 = arith.truncf %111 : vector<8x32xf32> to vector<8x32xbf16>
    %113 = arith.index_cast %c2_i32 : i32 to index
    %c0_28 = arith.constant 0 : index
    %c0_29 = arith.constant 0 : index
    %114 = vector.load %arg6[%113, %c0_28, %c0_29] : memref<8x8x32xbf16, #tpu.memory_space<vmem>>, vector<1x8x32xbf16>
    %115 = vector.shape_cast %114 : vector<1x8x32xbf16> to vector<8x32xbf16>
    %116 = vector.shape_cast %112 : vector<8x32xbf16> to vector<1x8x32xbf16>
    tpu.vector_store %arg6[%113, %c0_28, %c0_29], %116 {strides = array<i32>} : memref<8x8x32xbf16, #tpu.memory_space<vmem>>, vector<1x8x32xbf16>,
    %c3_i32 = arith.constant 3 : i32
    %117 = arith.index_cast %c3_i32 : i32 to index
    %c0_30 = arith.constant 0 : index
    %c0_31 = arith.constant 0 : index
    %118 = vector.load %arg2[%117, %c0_30, %c0_31] : memref<8x8x128xbf16, #tpu.memory_space<vmem>>, vector<1x8x128xbf16>
    %119 = vector.shape_cast %118 : vector<1x8x128xbf16> to vector<8x128xbf16>
    %120 = arith.extf %119 : vector<8x128xbf16> to vector<8x128xf32>
    %121 = arith.truncf %111 : vector<8x32xf32> to vector<8x32xbf16>
    %cst_32 = arith.constant dense<0.000000e+00> : vector<8x128xf32>
    %122 = tpu.matmul %121, %3, %cst_32 {dimension_numbers = #tpu.dot_dimension_numbers<[1], [0], [0], [1], [0, 0, 1, 1], [], []>} : vector<8x32xbf16>, vector<32x128xbf16>, vector<8x128xf32> -> vector<8x128xf32>
    %123 = arith.addf %120, %122 : vector<8x128xf32>
    %124 = vector.extract_strided_slice %123 {offsets = [0, 0], sizes = [8, 32], strides = [1, 1]} : vector<8x128xf32> to vector<8x32xf32>
    %125 = arith.negf %124 : vector<8x32xf32>
    %126 = math.exp %125 : vector<8x32xf32>
    %cst_33 = arith.constant 1.000000e+00 : f32
    %127 = vector.broadcast %cst_33 : f32 to vector<8x32xf32>
    %128 = arith.addf %127, %126 : vector<8x32xf32>
    %129 = arith.divf %127, %128 : vector<8x32xf32>
    %130 = vector.extract_strided_slice %123 {offsets = [0, 32], sizes = [8, 32], strides = [1, 1]} : vector<8x128xf32> to vector<8x32xf32>
    %131 = arith.negf %130 : vector<8x32xf32>
    %132 = math.exp %131 : vector<8x32xf32>
    %cst_34 = arith.constant 1.000000e+00 : f32
    %133 = vector.broadcast %cst_34 : f32 to vector<8x32xf32>
    %134 = arith.addf %133, %132 : vector<8x32xf32>
    %135 = arith.divf %133, %134 : vector<8x32xf32>
    %136 = vector.extract_strided_slice %123 {offsets = [0, 64], sizes = [8, 32], strides = [1, 1]} : vector<8x128xf32> to vector<8x32xf32>
    %137 = math.tanh %136 : vector<8x32xf32>
    %138 = vector.extract_strided_slice %123 {offsets = [0, 96], sizes = [8, 32], strides = [1, 1]} : vector<8x128xf32> to vector<8x32xf32>
    %139 = arith.negf %138 : vector<8x32xf32>
    %140 = math.exp %139 : vector<8x32xf32>
    %cst_35 = arith.constant 1.000000e+00 : f32
    %141 = vector.broadcast %cst_35 : f32 to vector<8x32xf32>
    %142 = arith.addf %141, %140 : vector<8x32xf32>
    %143 = arith.divf %141, %142 : vector<8x32xf32>
    %144 = arith.mulf %135, %109 : vector<8x32xf32>
    %145 = arith.mulf %129, %137 : vector<8x32xf32>
    %146 = arith.addf %144, %145 : vector<8x32xf32>
    %147 = math.tanh %146 : vector<8x32xf32>
    %148 = arith.mulf %143, %147 : vector<8x32xf32>
    %149 = arith.truncf %148 : vector<8x32xf32> to vector<8x32xbf16>
    %150 = arith.index_cast %c3_i32 : i32 to index
    %c0_36 = arith.constant 0 : index
    %c0_37 = arith.constant 0 : index
    %151 = vector.load %arg6[%150, %c0_36, %c0_37] : memref<8x8x32xbf16, #tpu.memory_space<vmem>>, vector<1x8x32xbf16>
    %152 = vector.shape_cast %151 : vector<1x8x32xbf16> to vector<8x32xbf16>
    %153 = vector.shape_cast %149 : vector<8x32xbf16> to vector<1x8x32xbf16>
    tpu.vector_store %arg6[%150, %c0_36, %c0_37], %153 {strides = array<i32>} : memref<8x8x32xbf16, #tpu.memory_space<vmem>>, vector<1x8x32xbf16>,
    %c4_i32 = arith.constant 4 : i32
    %154 = arith.index_cast %c4_i32 : i32 to index
    %c0_38 = arith.constant 0 : index
    %c0_39 = arith.constant 0 : index
    %155 = vector.load %arg2[%154, %c0_38, %c0_39] : memref<8x8x128xbf16, #tpu.memory_space<vmem>>, vector<1x8x128xbf16>
    %156 = vector.shape_cast %155 : vector<1x8x128xbf16> to vector<8x128xbf16>
    %157 = arith.extf %156 : vector<8x128xbf16> to vector<8x128xf32>
    %158 = arith.truncf %148 : vector<8x32xf32> to vector<8x32xbf16>
    %cst_40 = arith.constant dense<0.000000e+00> : vector<8x128xf32>
    %159 = tpu.matmul %158, %3, %cst_40 {dimension_numbers = #tpu.dot_dimension_numbers<[1], [0], [0], [1], [0, 0, 1, 1], [], []>} : vector<8x32xbf16>, vector<32x128xbf16>, vector<8x128xf32> -> vector<8x128xf32>
    %160 = arith.addf %157, %159 : vector<8x128xf32>
    %161 = vector.extract_strided_slice %160 {offsets = [0, 0], sizes = [8, 32], strides = [1, 1]} : vector<8x128xf32> to vector<8x32xf32>
    %162 = arith.negf %161 : vector<8x32xf32>
    %163 = math.exp %162 : vector<8x32xf32>
    %cst_41 = arith.constant 1.000000e+00 : f32
    %164 = vector.broadcast %cst_41 : f32 to vector<8x32xf32>
    %165 = arith.addf %164, %163 : vector<8x32xf32>
    %166 = arith.divf %164, %165 : vector<8x32xf32>
    %167 = vector.extract_strided_slice %160 {offsets = [0, 32], sizes = [8, 32], strides = [1, 1]} : vector<8x128xf32> to vector<8x32xf32>
    %168 = arith.negf %167 : vector<8x32xf32>
    %169 = math.exp %168 : vector<8x32xf32>
    %cst_42 = arith.constant 1.000000e+00 : f32
    %170 = vector.broadcast %cst_42 : f32 to vector<8x32xf32>
    %171 = arith.addf %170, %169 : vector<8x32xf32>
    %172 = arith.divf %170, %171 : vector<8x32xf32>
    %173 = vector.extract_strided_slice %160 {offsets = [0, 64], sizes = [8, 32], strides = [1, 1]} : vector<8x128xf32> to vector<8x32xf32>
    %174 = math.tanh %173 : vector<8x32xf32>
    %175 = vector.extract_strided_slice %160 {offsets = [0, 96], sizes = [8, 32], strides = [1, 1]} : vector<8x128xf32> to vector<8x32xf32>
    %176 = arith.negf %175 : vector<8x32xf32>
    %177 = math.exp %176 : vector<8x32xf32>
    %cst_43 = arith.constant 1.000000e+00 : f32
    %178 = vector.broadcast %cst_43 : f32 to vector<8x32xf32>
    %179 = arith.addf %178, %177 : vector<8x32xf32>
    %180 = arith.divf %178, %179 : vector<8x32xf32>
    %181 = arith.mulf %172, %146 : vector<8x32xf32>
    %182 = arith.mulf %166, %174 : vector<8x32xf32>
    %183 = arith.addf %181, %182 : vector<8x32xf32>
    %184 = math.tanh %183 : vector<8x32xf32>
    %185 = arith.mulf %180, %184 : vector<8x32xf32>
    %186 = arith.truncf %185 : vector<8x32xf32> to vector<8x32xbf16>
    %187 = arith.index_cast %c4_i32 : i32 to index
    %c0_44 = arith.constant 0 : index
    %c0_45 = arith.constant 0 : index
    %188 = vector.load %arg6[%187, %c0_44, %c0_45] : memref<8x8x32xbf16, #tpu.memory_space<vmem>>, vector<1x8x32xbf16>
    %189 = vector.shape_cast %188 : vector<1x8x32xbf16> to vector<8x32xbf16>
    %190 = vector.shape_cast %186 : vector<8x32xbf16> to vector<1x8x32xbf16>
    tpu.vector_store %arg6[%187, %c0_44, %c0_45], %190 {strides = array<i32>} : memref<8x8x32xbf16, #tpu.memory_space<vmem>>, vector<1x8x32xbf16>,
    %c5_i32 = arith.constant 5 : i32
    %191 = arith.index_cast %c5_i32 : i32 to index
    %c0_46 = arith.constant 0 : index
    %c0_47 = arith.constant 0 : index
    %192 = vector.load %arg2[%191, %c0_46, %c0_47] : memref<8x8x128xbf16, #tpu.memory_space<vmem>>, vector<1x8x128xbf16>
    %193 = vector.shape_cast %192 : vector<1x8x128xbf16> to vector<8x128xbf16>
    %194 = arith.extf %193 : vector<8x128xbf16> to vector<8x128xf32>
    %195 = arith.truncf %185 : vector<8x32xf32> to vector<8x32xbf16>
    %cst_48 = arith.constant dense<0.000000e+00> : vector<8x128xf32>
    %196 = tpu.matmul %195, %3, %cst_48 {dimension_numbers = #tpu.dot_dimension_numbers<[1], [0], [0], [1], [0, 0, 1, 1], [], []>} : vector<8x32xbf16>, vector<32x128xbf16>, vector<8x128xf32> -> vector<8x128xf32>
    %197 = arith.addf %194, %196 : vector<8x128xf32>
    %198 = vector.extract_strided_slice %197 {offsets = [0, 0], sizes = [8, 32], strides = [1, 1]} : vector<8x128xf32> to vector<8x32xf32>
    %199 = arith.negf %198 : vector<8x32xf32>
    %200 = math.exp %199 : vector<8x32xf32>
    %cst_49 = arith.constant 1.000000e+00 : f32
    %201 = vector.broadcast %cst_49 : f32 to vector<8x32xf32>
    %202 = arith.addf %201, %200 : vector<8x32xf32>
    %203 = arith.divf %201, %202 : vector<8x32xf32>
    %204 = vector.extract_strided_slice %197 {offsets = [0, 32], sizes = [8, 32], strides = [1, 1]} : vector<8x128xf32> to vector<8x32xf32>
    %205 = arith.negf %204 : vector<8x32xf32>
    %206 = math.exp %205 : vector<8x32xf32>
    %cst_50 = arith.constant 1.000000e+00 : f32
    %207 = vector.broadcast %cst_50 : f32 to vector<8x32xf32>
    %208 = arith.addf %207, %206 : vector<8x32xf32>
    %209 = arith.divf %207, %208 : vector<8x32xf32>
    %210 = vector.extract_strided_slice %197 {offsets = [0, 64], sizes = [8, 32], strides = [1, 1]} : vector<8x128xf32> to vector<8x32xf32>
    %211 = math.tanh %210 : vector<8x32xf32>
    %212 = vector.extract_strided_slice %197 {offsets = [0, 96], sizes = [8, 32], strides = [1, 1]} : vector<8x128xf32> to vector<8x32xf32>
    %213 = arith.negf %212 : vector<8x32xf32>
    %214 = math.exp %213 : vector<8x32xf32>
    %cst_51 = arith.constant 1.000000e+00 : f32
    %215 = vector.broadcast %cst_51 : f32 to vector<8x32xf32>
    %216 = arith.addf %215, %214 : vector<8x32xf32>
    %217 = arith.divf %215, %216 : vector<8x32xf32>
    %218 = arith.mulf %209, %183 : vector<8x32xf32>
    %219 = arith.mulf %203, %211 : vector<8x32xf32>
    %220 = arith.addf %218, %219 : vector<8x32xf32>
    %221 = math.tanh %220 : vector<8x32xf32>
    %222 = arith.mulf %217, %221 : vector<8x32xf32>
    %223 = arith.truncf %222 : vector<8x32xf32> to vector<8x32xbf16>
    %224 = arith.index_cast %c5_i32 : i32 to index
    %c0_52 = arith.constant 0 : index
    %c0_53 = arith.constant 0 : index
    %225 = vector.load %arg6[%224, %c0_52, %c0_53] : memref<8x8x32xbf16, #tpu.memory_space<vmem>>, vector<1x8x32xbf16>
    %226 = vector.shape_cast %225 : vector<1x8x32xbf16> to vector<8x32xbf16>
    %227 = vector.shape_cast %223 : vector<8x32xbf16> to vector<1x8x32xbf16>
    tpu.vector_store %arg6[%224, %c0_52, %c0_53], %227 {strides = array<i32>} : memref<8x8x32xbf16, #tpu.memory_space<vmem>>, vector<1x8x32xbf16>,
    %c6_i32 = arith.constant 6 : i32
    %228 = arith.index_cast %c6_i32 : i32 to index
    %c0_54 = arith.constant 0 : index
    %c0_55 = arith.constant 0 : index
    %229 = vector.load %arg2[%228, %c0_54, %c0_55] : memref<8x8x128xbf16, #tpu.memory_space<vmem>>, vector<1x8x128xbf16>
    %230 = vector.shape_cast %229 : vector<1x8x128xbf16> to vector<8x128xbf16>
    %231 = arith.extf %230 : vector<8x128xbf16> to vector<8x128xf32>
    %232 = arith.truncf %222 : vector<8x32xf32> to vector<8x32xbf16>
    %cst_56 = arith.constant dense<0.000000e+00> : vector<8x128xf32>
    %233 = tpu.matmul %232, %3, %cst_56 {dimension_numbers = #tpu.dot_dimension_numbers<[1], [0], [0], [1], [0, 0, 1, 1], [], []>} : vector<8x32xbf16>, vector<32x128xbf16>, vector<8x128xf32> -> vector<8x128xf32>
    %234 = arith.addf %231, %233 : vector<8x128xf32>
    %235 = vector.extract_strided_slice %234 {offsets = [0, 0], sizes = [8, 32], strides = [1, 1]} : vector<8x128xf32> to vector<8x32xf32>
    %236 = arith.negf %235 : vector<8x32xf32>
    %237 = math.exp %236 : vector<8x32xf32>
    %cst_57 = arith.constant 1.000000e+00 : f32
    %238 = vector.broadcast %cst_57 : f32 to vector<8x32xf32>
    %239 = arith.addf %238, %237 : vector<8x32xf32>
    %240 = arith.divf %238, %239 : vector<8x32xf32>
    %241 = vector.extract_strided_slice %234 {offsets = [0, 32], sizes = [8, 32], strides = [1, 1]} : vector<8x128xf32> to vector<8x32xf32>
    %242 = arith.negf %241 : vector<8x32xf32>
    %243 = math.exp %242 : vector<8x32xf32>
    %cst_58 = arith.constant 1.000000e+00 : f32
    %244 = vector.broadcast %cst_58 : f32 to vector<8x32xf32>
    %245 = arith.addf %244, %243 : vector<8x32xf32>
    %246 = arith.divf %244, %245 : vector<8x32xf32>
    %247 = vector.extract_strided_slice %234 {offsets = [0, 64], sizes = [8, 32], strides = [1, 1]} : vector<8x128xf32> to vector<8x32xf32>
    %248 = math.tanh %247 : vector<8x32xf32>
    %249 = vector.extract_strided_slice %234 {offsets = [0, 96], sizes = [8, 32], strides = [1, 1]} : vector<8x128xf32> to vector<8x32xf32>
    %250 = arith.negf %249 : vector<8x32xf32>
    %251 = math.exp %250 : vector<8x32xf32>
    %cst_59 = arith.constant 1.000000e+00 : f32
    %252 = vector.broadcast %cst_59 : f32 to vector<8x32xf32>
    %253 = arith.addf %252, %251 : vector<8x32xf32>
    %254 = arith.divf %252, %253 : vector<8x32xf32>
    %255 = arith.mulf %246, %220 : vector<8x32xf32>
    %256 = arith.mulf %240, %248 : vector<8x32xf32>
    %257 = arith.addf %255, %256 : vector<8x32xf32>
    %258 = math.tanh %257 : vector<8x32xf32>
    %259 = arith.mulf %254, %258 : vector<8x32xf32>
    %260 = arith.truncf %259 : vector<8x32xf32> to vector<8x32xbf16>
    %261 = arith.index_cast %c6_i32 : i32 to index
    %c0_60 = arith.constant 0 : index
    %c0_61 = arith.constant 0 : index
    %262 = vector.load %arg6[%261, %c0_60, %c0_61] : memref<8x8x32xbf16, #tpu.memory_space<vmem>>, vector<1x8x32xbf16>
    %263 = vector.shape_cast %262 : vector<1x8x32xbf16> to vector<8x32xbf16>
    %264 = vector.shape_cast %260 : vector<8x32xbf16> to vector<1x8x32xbf16>
    tpu.vector_store %arg6[%261, %c0_60, %c0_61], %264 {strides = array<i32>} : memref<8x8x32xbf16, #tpu.memory_space<vmem>>, vector<1x8x32xbf16>,
    %c7_i32 = arith.constant 7 : i32
    %265 = arith.index_cast %c7_i32 : i32 to index
    %c0_62 = arith.constant 0 : index
    %c0_63 = arith.constant 0 : index
    %266 = vector.load %arg2[%265, %c0_62, %c0_63] : memref<8x8x128xbf16, #tpu.memory_space<vmem>>, vector<1x8x128xbf16>
    %267 = vector.shape_cast %266 : vector<1x8x128xbf16> to vector<8x128xbf16>
    %268 = arith.extf %267 : vector<8x128xbf16> to vector<8x128xf32>
    %269 = arith.truncf %259 : vector<8x32xf32> to vector<8x32xbf16>
    %cst_64 = arith.constant dense<0.000000e+00> : vector<8x128xf32>
    %270 = tpu.matmul %269, %3, %cst_64 {dimension_numbers = #tpu.dot_dimension_numbers<[1], [0], [0], [1], [0, 0, 1, 1], [], []>} : vector<8x32xbf16>, vector<32x128xbf16>, vector<8x128xf32> -> vector<8x128xf32>
    %271 = arith.addf %268, %270 : vector<8x128xf32>
    %272 = vector.extract_strided_slice %271 {offsets = [0, 0], sizes = [8, 32], strides = [1, 1]} : vector<8x128xf32> to vector<8x32xf32>
    %273 = arith.negf %272 : vector<8x32xf32>
    %274 = math.exp %273 : vector<8x32xf32>
    %cst_65 = arith.constant 1.000000e+00 : f32
    %275 = vector.broadcast %cst_65 : f32 to vector<8x32xf32>
    %276 = arith.addf %275, %274 : vector<8x32xf32>
    %277 = arith.divf %275, %276 : vector<8x32xf32>
    %278 = vector.extract_strided_slice %271 {offsets = [0, 32], sizes = [8, 32], strides = [1, 1]} : vector<8x128xf32> to vector<8x32xf32>
    %279 = arith.negf %278 : vector<8x32xf32>
    %280 = math.exp %279 : vector<8x32xf32>
    %cst_66 = arith.constant 1.000000e+00 : f32
    %281 = vector.broadcast %cst_66 : f32 to vector<8x32xf32>
    %282 = arith.addf %281, %280 : vector<8x32xf32>
    %283 = arith.divf %281, %282 : vector<8x32xf32>
    %284 = vector.extract_strided_slice %271 {offsets = [0, 64], sizes = [8, 32], strides = [1, 1]} : vector<8x128xf32> to vector<8x32xf32>
    %285 = math.tanh %284 : vector<8x32xf32>
    %286 = vector.extract_strided_slice %271 {offsets = [0, 96], sizes = [8, 32], strides = [1, 1]} : vector<8x128xf32> to vector<8x32xf32>
    %287 = arith.negf %286 : vector<8x32xf32>
    %288 = math.exp %287 : vector<8x32xf32>
    %cst_67 = arith.constant 1.000000e+00 : f32
    %289 = vector.broadcast %cst_67 : f32 to vector<8x32xf32>
    %290 = arith.addf %289, %288 : vector<8x32xf32>
    %291 = arith.divf %289, %290 : vector<8x32xf32>
    %292 = arith.mulf %283, %257 : vector<8x32xf32>
    %293 = arith.mulf %277, %285 : vector<8x32xf32>
    %294 = arith.addf %292, %293 : vector<8x32xf32>
    %295 = math.tanh %294 : vector<8x32xf32>
    %296 = arith.mulf %291, %295 : vector<8x32xf32>
    %297 = arith.truncf %296 : vector<8x32xf32> to vector<8x32xbf16>
    %298 = arith.index_cast %c7_i32 : i32 to index
    %c0_68 = arith.constant 0 : index
    %c0_69 = arith.constant 0 : index
    %299 = vector.load %arg6[%298, %c0_68, %c0_69] : memref<8x8x32xbf16, #tpu.memory_space<vmem>>, vector<1x8x32xbf16>
    %300 = vector.shape_cast %299 : vector<1x8x32xbf16> to vector<8x32xbf16>
    %301 = vector.shape_cast %297 : vector<8x32xbf16> to vector<1x8x32xbf16>
    tpu.vector_store %arg6[%298, %c0_68, %c0_69], %301 {strides = array<i32>} : memref<8x8x32xbf16, #tpu.memory_space<vmem>>, vector<1x8x32xbf16>,
    %c8_i32 = arith.constant 8 : i32
    %c0_70 = arith.constant 0 : index
    %c0_71 = arith.constant 0 : index
    %302 = vector.load %arg9[%c0_70, %c0_71] : memref<8x32xf32, #tpu.memory_space<vmem>>, vector<8x32xf32>
    tpu.vector_store %arg9[%c0_70, %c0_71], %296 {strides = array<i32>} : memref<8x32xf32, #tpu.memory_space<vmem>>, vector<8x32xf32>,
    %c0_72 = arith.constant 0 : index
    %c0_73 = arith.constant 0 : index
    %303 = vector.load %arg10[%c0_72, %c0_73] : memref<8x32xf32, #tpu.memory_space<vmem>>, vector<8x32xf32>
    tpu.vector_store %arg10[%c0_72, %c0_73], %294 {strides = array<i32>} : memref<8x32xf32, #tpu.memory_space<vmem>>, vector<8x32xf32>,
    %c0_i32_74 = arith.constant 0 : i32
    %304 = arith.cmpi eq, %arg1, %c0_i32_74 : i32
    %305 = arith.extui %304 : i1 to i32
    %c0_i32_75 = arith.constant 0 : i32
    %306 = arith.cmpi ne, %305, %c0_i32_75 : i32
    scf.if %306 {
      %c0_76 = arith.constant 0 : index
      %c0_77 = arith.constant 0 : index
      %307 = vector.load %arg9[%c0_76, %c0_77] : memref<8x32xf32, #tpu.memory_space<vmem>>, vector<8x32xf32>
      %c0_78 = arith.constant 0 : index
      %c0_79 = arith.constant 0 : index
      %308 = vector.load %arg7[%c0_78, %c0_79] : memref<8x32xf32, #tpu.memory_space<vmem>>, vector<8x32xf32>
      tpu.vector_store %arg7[%c0_78, %c0_79], %307 {strides = array<i32>} : memref<8x32xf32, #tpu.memory_space<vmem>>, vector<8x32xf32>,
      %c0_80 = arith.constant 0 : index
      %c0_81 = arith.constant 0 : index
      %309 = vector.load %arg10[%c0_80, %c0_81] : memref<8x32xf32, #tpu.memory_space<vmem>>, vector<8x32xf32>
      %c0_82 = arith.constant 0 : index
      %c0_83 = arith.constant 0 : index
      %310 = vector.load %arg8[%c0_82, %c0_83] : memref<8x32xf32, #tpu.memory_space<vmem>>, vector<8x32xf32>
      tpu.vector_store %arg8[%c0_82, %c0_83], %309 {strides = array<i32>} : memref<8x32xf32, #tpu.memory_space<vmem>>, vector<8x32xf32>,
    } else {
    }
    return
  }
  func.func @transform_0(%arg0: i32, %arg1: i32) -> (i32, i32, i32) {
    %c0_i32 = arith.constant 0 : i32
    %c0_i32_0 = arith.constant 0 : i32
    return %arg1, %arg0, %c0_i32 : i32, i32, i32
  }
  func.func @transform_1(%arg0: i32, %arg1: i32) -> (i32, i32) {
    %c0_i32 = arith.constant 0 : i32
    %c0_i32_0 = arith.constant 0 : i32
    %c0_i32_1 = arith.constant 0 : i32
    return %c0_i32, %c0_i32_0 : i32, i32
  }
  func.func @transform_2(%arg0: i32, %arg1: i32) -> (i32, i32) {
    %c0_i32 = arith.constant 0 : i32
    %c0_i32_0 = arith.constant 0 : i32
    return %arg0, %c0_i32 : i32, i32
  }
  func.func @transform_3(%arg0: i32, %arg1: i32) -> (i32, i32) {
    %c0_i32 = arith.constant 0 : i32
    %c0_i32_0 = arith.constant 0 : i32
    return %arg0, %c0_i32 : i32, i32
  }
  func.func @transform_4(%arg0: i32, %arg1: i32) -> (i32, i32, i32) {
    %c0_i32 = arith.constant 0 : i32
    %c0_i32_0 = arith.constant 0 : i32
    return %arg1, %arg0, %c0_i32 : i32, i32, i32
  }
  func.func @transform_5(%arg0: i32, %arg1: i32) -> (i32, i32) {
    %c0_i32 = arith.constant 0 : i32
    %c0_i32_0 = arith.constant 0 : i32
    return %arg0, %c0_i32 : i32, i32
  }
  func.func @transform_6(%arg0: i32, %arg1: i32) -> (i32, i32) {
    %c0_i32 = arith.constant 0 : i32
    %c0_i32_0 = arith.constant 0 : i32
    return %arg0, %c0_i32 : i32, i32
  }
}

module attributes {stable_mosaic.version = 11 : i64} {
  func.func @_lstm_chunk_kernel(%arg0: i32, %arg1: i32, %arg2: memref<8x8x128xbf16, #tpu.memory_space<vmem>>, %arg3: memref<32x128xbf16, #tpu.memory_space<vmem>>, %arg4: memref<8x32xf32, #tpu.memory_space<vmem>>, %arg5: memref<8x32xf32, #tpu.memory_space<vmem>>, %arg6: memref<8x8x32xbf16, #tpu.memory_space<vmem>>, %arg7: memref<8x32xf32, #tpu.memory_space<vmem>>, %arg8: memref<8x32xf32, #tpu.memory_space<vmem>>, %arg9: memref<8x32xf32, #tpu.memory_space<vmem>>, %arg10: memref<8x32xf32, #tpu.memory_space<vmem>>) attributes {dimension_semantics = [#tpu.dimension_semantics<parallel>, #tpu.dimension_semantics<arbitrary>], iteration_bounds = array<i64: 1, 1>, scalar_prefetch = 0 : i64, scratch_operands = 2 : i64, tpu.core_type = #tpu.core_type<tc>, window_params = [{transform_indices = @transform_0, window_bounds = array<i64: 8, 8, 128>}, {pipeline_mode = #tpu.pipeline_mode<synchronous>, transform_indices = @transform_1, window_bounds = array<i64: 32, 128>}, {transform_indices = @transform_2, window_bounds = array<i64: 8, 32>}, {transform_indices = @transform_3, window_bounds = array<i64: 8, 32>}, {transform_indices = @transform_4, window_bounds = array<i64: 8, 8, 32>}, {transform_indices = @transform_5, window_bounds = array<i64: 8, 32>}, {transform_indices = @transform_6, window_bounds = array<i64: 8, 32>}]} {
    %c0_i32 = arith.constant 0 : i32
    %0 = arith.cmpi eq, %arg1, %c0_i32 : i32
    %1 = arith.extui %0 : i1 to i32
    %c0_i32_0 = arith.constant 0 : i32
    %2 = arith.cmpi ne, %1, %c0_i32_0 : i32
    scf.if %2 {
      %c0_76 = arith.constant 0 : index
      %c0_77 = arith.constant 0 : index
      %307 = vector.load %arg4[%c0_76, %c0_77] : memref<8x32xf32, #tpu.memory_space<vmem>>, vector<8x32xf32>
      %c0_78 = arith.constant 0 : index
      %c0_79 = arith.constant 0 : index
      %308 = vector.load %arg9[%c0_78, %c0_79] : memref<8x32xf32, #tpu.memory_space<vmem>>, vector<8x32xf32>
      tpu.vector_store %arg9[%c0_78, %c0_79], %307 {strides = array<i32>} : memref<8x32xf32, #tpu.memory_space<vmem>>, vector<8x32xf32>,
      %c0_80 = arith.constant 0 : index
      %c0_81 = arith.constant 0 : index
      %309 = vector.load %arg5[%c0_80, %c0_81] : memref<8x32xf32, #tpu.memory_space<vmem>>, vector<8x32xf32>
      %c0_82 = arith.constant 0 : index
      %c0_83 = arith.constant 0 : index
      %310 = vector.load %arg10[%c0_82, %c0_83] : memref<8x32xf32, #tpu.memory_space<vmem>>, vector<8x32xf32>
      tpu.vector_store %arg10[%c0_82, %c0_83], %309 {strides = array<i32>} : memref<8x32xf32, #tpu.memory_space<vmem>>, vector<8x32xf32>,
    } else {
    }
    %c0 = arith.constant 0 : index
    %c0_1 = arith.constant 0 : index
    %3 = vector.load %arg3[%c0, %c0_1] : memref<32x128xbf16, #tpu.memory_space<vmem>>, vector<32x128xbf16>
    %c0_2 = arith.constant 0 : index
    %c0_3 = arith.constant 0 : index
    %4 = vector.load %arg9[%c0_2, %c0_3] : memref<8x32xf32, #tpu.memory_space<vmem>>, vector<8x32xf32>
    %c0_4 = arith.constant 0 : index
    %c0_5 = arith.constant 0 : index
    %5 = vector.load %arg10[%c0_4, %c0_5] : memref<8x32xf32, #tpu.memory_space<vmem>>, vector<8x32xf32>
    %c0_i32_6 = arith.constant 0 : i32
    %6 = arith.index_cast %c0_i32_6 : i32 to index
    %c0_7 = arith.constant 0 : index
    %c0_8 = arith.constant 0 : index
    %7 = vector.load %arg2[%6, %c0_7, %c0_8] : memref<8x8x128xbf16, #tpu.memory_space<vmem>>, vector<1x8x128xbf16>
    %8 = vector.shape_cast %7 : vector<1x8x128xbf16> to vector<8x128xbf16>
    %9 = arith.extf %8 : vector<8x128xbf16> to vector<8x128xf32>
    %10 = arith.truncf %4 : vector<8x32xf32> to vector<8x32xbf16>
    %cst = arith.constant dense<0.000000e+00> : vector<8x128xf32>
    %11 = tpu.matmul %10, %3, %cst {dimension_numbers = #tpu.dot_dimension_numbers<[1], [0], [0], [1], [0, 0, 1, 1], [], []>} : vector<8x32xbf16>, vector<32x128xbf16>, vector<8x128xf32> -> vector<8x128xf32>
    %12 = arith.addf %9, %11 : vector<8x128xf32>
    %13 = vector.extract_strided_slice %12 {offsets = [0, 0], sizes = [8, 32], strides = [1, 1]} : vector<8x128xf32> to vector<8x32xf32>
    %14 = arith.negf %13 : vector<8x32xf32>
    %15 = math.exp %14 : vector<8x32xf32>
    %cst_9 = arith.constant 1.000000e+00 : f32
    %16 = vector.broadcast %cst_9 : f32 to vector<8x32xf32>
    %17 = arith.addf %16, %15 : vector<8x32xf32>
    %18 = arith.divf %16, %17 : vector<8x32xf32>
    %19 = vector.extract_strided_slice %12 {offsets = [0, 32], sizes = [8, 32], strides = [1, 1]} : vector<8x128xf32> to vector<8x32xf32>
    %20 = arith.negf %19 : vector<8x32xf32>
    %21 = math.exp %20 : vector<8x32xf32>
    %cst_10 = arith.constant 1.000000e+00 : f32
    %22 = vector.broadcast %cst_10 : f32 to vector<8x32xf32>
    %23 = arith.addf %22, %21 : vector<8x32xf32>
    %24 = arith.divf %22, %23 : vector<8x32xf32>
    %25 = vector.extract_strided_slice %12 {offsets = [0, 64], sizes = [8, 32], strides = [1, 1]} : vector<8x128xf32> to vector<8x32xf32>
    %26 = math.tanh %25 : vector<8x32xf32>
    %27 = vector.extract_strided_slice %12 {offsets = [0, 96], sizes = [8, 32], strides = [1, 1]} : vector<8x128xf32> to vector<8x32xf32>
    %28 = arith.negf %27 : vector<8x32xf32>
    %29 = math.exp %28 : vector<8x32xf32>
    %cst_11 = arith.constant 1.000000e+00 : f32
    %30 = vector.broadcast %cst_11 : f32 to vector<8x32xf32>
    %31 = arith.addf %30, %29 : vector<8x32xf32>
    %32 = arith.divf %30, %31 : vector<8x32xf32>
    %33 = arith.mulf %24, %5 : vector<8x32xf32>
    %34 = arith.mulf %18, %26 : vector<8x32xf32>
    %35 = arith.addf %33, %34 : vector<8x32xf32>
    %36 = math.tanh %35 : vector<8x32xf32>
    %37 = arith.mulf %32, %36 : vector<8x32xf32>
    %38 = arith.truncf %37 : vector<8x32xf32> to vector<8x32xbf16>
    %39 = arith.index_cast %c0_i32_6 : i32 to index
    %c0_12 = arith.constant 0 : index
    %c0_13 = arith.constant 0 : index
    %40 = vector.load %arg6[%39, %c0_12, %c0_13] : memref<8x8x32xbf16, #tpu.memory_space<vmem>>, vector<1x8x32xbf16>
    %41 = vector.shape_cast %40 : vector<1x8x32xbf16> to vector<8x32xbf16>
    %42 = vector.shape_cast %38 : vector<8x32xbf16> to vector<1x8x32xbf16>
    tpu.vector_store %arg6[%39, %c0_12, %c0_13], %42 {strides = array<i32>} : memref<8x8x32xbf16, #tpu.memory_space<vmem>>, vector<1x8x32xbf16>,
    %c1_i32 = arith.constant 1 : i32
    %43 = arith.index_cast %c1_i32 : i32 to index
    %c0_14 = arith.constant 0 : index
    %c0_15 = arith.constant 0 : index
    %44 = vector.load %arg2[%43, %c0_14, %c0_15] : memref<8x8x128xbf16, #tpu.memory_space<vmem>>, vector<1x8x128xbf16>
    %45 = vector.shape_cast %44 : vector<1x8x128xbf16> to vector<8x128xbf16>
    %46 = arith.extf %45 : vector<8x128xbf16> to vector<8x128xf32>
    %47 = arith.truncf %37 : vector<8x32xf32> to vector<8x32xbf16>
    %cst_16 = arith.constant dense<0.000000e+00> : vector<8x128xf32>
    %48 = tpu.matmul %47, %3, %cst_16 {dimension_numbers = #tpu.dot_dimension_numbers<[1], [0], [0], [1], [0, 0, 1, 1], [], []>} : vector<8x32xbf16>, vector<32x128xbf16>, vector<8x128xf32> -> vector<8x128xf32>
    %49 = arith.addf %46, %48 : vector<8x128xf32>
    %50 = vector.extract_strided_slice %49 {offsets = [0, 0], sizes = [8, 32], strides = [1, 1]} : vector<8x128xf32> to vector<8x32xf32>
    %51 = arith.negf %50 : vector<8x32xf32>
    %52 = math.exp %51 : vector<8x32xf32>
    %cst_17 = arith.constant 1.000000e+00 : f32
    %53 = vector.broadcast %cst_17 : f32 to vector<8x32xf32>
    %54 = arith.addf %53, %52 : vector<8x32xf32>
    %55 = arith.divf %53, %54 : vector<8x32xf32>
    %56 = vector.extract_strided_slice %49 {offsets = [0, 32], sizes = [8, 32], strides = [1, 1]} : vector<8x128xf32> to vector<8x32xf32>
    %57 = arith.negf %56 : vector<8x32xf32>
    %58 = math.exp %57 : vector<8x32xf32>
    %cst_18 = arith.constant 1.000000e+00 : f32
    %59 = vector.broadcast %cst_18 : f32 to vector<8x32xf32>
    %60 = arith.addf %59, %58 : vector<8x32xf32>
    %61 = arith.divf %59, %60 : vector<8x32xf32>
    %62 = vector.extract_strided_slice %49 {offsets = [0, 64], sizes = [8, 32], strides = [1, 1]} : vector<8x128xf32> to vector<8x32xf32>
    %63 = math.tanh %62 : vector<8x32xf32>
    %64 = vector.extract_strided_slice %49 {offsets = [0, 96], sizes = [8, 32], strides = [1, 1]} : vector<8x128xf32> to vector<8x32xf32>
    %65 = arith.negf %64 : vector<8x32xf32>
    %66 = math.exp %65 : vector<8x32xf32>
    %cst_19 = arith.constant 1.000000e+00 : f32
    %67 = vector.broadcast %cst_19 : f32 to vector<8x32xf32>
    %68 = arith.addf %67, %66 : vector<8x32xf32>
    %69 = arith.divf %67, %68 : vector<8x32xf32>
    %70 = arith.mulf %61, %35 : vector<8x32xf32>
    %71 = arith.mulf %55, %63 : vector<8x32xf32>
    %72 = arith.addf %70, %71 : vector<8x32xf32>
    %73 = math.tanh %72 : vector<8x32xf32>
    %74 = arith.mulf %69, %73 : vector<8x32xf32>
    %75 = arith.truncf %74 : vector<8x32xf32> to vector<8x32xbf16>
    %76 = arith.index_cast %c1_i32 : i32 to index
    %c0_20 = arith.constant 0 : index
    %c0_21 = arith.constant 0 : index
    %77 = vector.load %arg6[%76, %c0_20, %c0_21] : memref<8x8x32xbf16, #tpu.memory_space<vmem>>, vector<1x8x32xbf16>
    %78 = vector.shape_cast %77 : vector<1x8x32xbf16> to vector<8x32xbf16>
    %79 = vector.shape_cast %75 : vector<8x32xbf16> to vector<1x8x32xbf16>
    tpu.vector_store %arg6[%76, %c0_20, %c0_21], %79 {strides = array<i32>} : memref<8x8x32xbf16, #tpu.memory_space<vmem>>, vector<1x8x32xbf16>,
    %c2_i32 = arith.constant 2 : i32
    %80 = arith.index_cast %c2_i32 : i32 to index
    %c0_22 = arith.constant 0 : index
    %c0_23 = arith.constant 0 : index
    %81 = vector.load %arg2[%80, %c0_22, %c0_23] : memref<8x8x128xbf16, #tpu.memory_space<vmem>>, vector<1x8x128xbf16>
    %82 = vector.shape_cast %81 : vector<1x8x128xbf16> to vector<8x128xbf16>
    %83 = arith.extf %82 : vector<8x128xbf16> to vector<8x128xf32>
    %84 = arith.truncf %74 : vector<8x32xf32> to vector<8x32xbf16>
    %cst_24 = arith.constant dense<0.000000e+00> : vector<8x128xf32>
    %85 = tpu.matmul %84, %3, %cst_24 {dimension_numbers = #tpu.dot_dimension_numbers<[1], [0], [0], [1], [0, 0, 1, 1], [], []>} : vector<8x32xbf16>, vector<32x128xbf16>, vector<8x128xf32> -> vector<8x128xf32>
    %86 = arith.addf %83, %85 : vector<8x128xf32>
    %87 = vector.extract_strided_slice %86 {offsets = [0, 0], sizes = [8, 32], strides = [1, 1]} : vector<8x128xf32> to vector<8x32xf32>
    %88 = arith.negf %87 : vector<8x32xf32>
    %89 = math.exp %88 : vector<8x32xf32>
    %cst_25 = arith.constant 1.000000e+00 : f32
    %90 = vector.broadcast %cst_25 : f32 to vector<8x32xf32>
    %91 = arith.addf %90, %89 : vector<8x32xf32>
    %92 = arith.divf %90, %91 : vector<8x32xf32>
    %93 = vector.extract_strided_slice %86 {offsets = [0, 32], sizes = [8, 32], strides = [1, 1]} : vector<8x128xf32> to vector<8x32xf32>
    %94 = arith.negf %93 : vector<8x32xf32>
    %95 = math.exp %94 : vector<8x32xf32>
    %cst_26 = arith.constant 1.000000e+00 : f32
    %96 = vector.broadcast %cst_26 : f32 to vector<8x32xf32>
    %97 = arith.addf %96, %95 : vector<8x32xf32>
    %98 = arith.divf %96, %97 : vector<8x32xf32>
    %99 = vector.extract_strided_slice %86 {offsets = [0, 64], sizes = [8, 32], strides = [1, 1]} : vector<8x128xf32> to vector<8x32xf32>
    %100 = math.tanh %99 : vector<8x32xf32>
    %101 = vector.extract_strided_slice %86 {offsets = [0, 96], sizes = [8, 32], strides = [1, 1]} : vector<8x128xf32> to vector<8x32xf32>
    %102 = arith.negf %101 : vector<8x32xf32>
    %103 = math.exp %102 : vector<8x32xf32>
    %cst_27 = arith.constant 1.000000e+00 : f32
    %104 = vector.broadcast %cst_27 : f32 to vector<8x32xf32>
    %105 = arith.addf %104, %103 : vector<8x32xf32>
    %106 = arith.divf %104, %105 : vector<8x32xf32>
    %107 = arith.mulf %98, %72 : vector<8x32xf32>
    %108 = arith.mulf %92, %100 : vector<8x32xf32>
    %109 = arith.addf %107, %108 : vector<8x32xf32>
    %110 = math.tanh %109 : vector<8x32xf32>
    %111 = arith.mulf %106, %110 : vector<8x32xf32>
    %112 = arith.truncf %111 : vector<8x32xf32> to vector<8x32xbf16>
    %113 = arith.index_cast %c2_i32 : i32 to index
    %c0_28 = arith.constant 0 : index
    %c0_29 = arith.constant 0 : index
    %114 = vector.load %arg6[%113, %c0_28, %c0_29] : memref<8x8x32xbf16, #tpu.memory_space<vmem>>, vector<1x8x32xbf16>
    %115 = vector.shape_cast %114 : vector<1x8x32xbf16> to vector<8x32xbf16>
    %116 = vector.shape_cast %112 : vector<8x32xbf16> to vector<1x8x32xbf16>
    tpu.vector_store %arg6[%113, %c0_28, %c0_29], %116 {strides = array<i32>} : memref<8x8x32xbf16, #tpu.memory_space<vmem>>, vector<1x8x32xbf16>,
    %c3_i32 = arith.constant 3 : i32
    %117 = arith.index_cast %c3_i32 : i32 to index
    %c0_30 = arith.constant 0 : index
    %c0_31 = arith.constant 0 : index
    %118 = vector.load %arg2[%117, %c0_30, %c0_31] : memref<8x8x128xbf16, #tpu.memory_space<vmem>>, vector<1x8x128xbf16>
    %119 = vector.shape_cast %118 : vector<1x8x128xbf16> to vector<8x128xbf16>
    %120 = arith.extf %119 : vector<8x128xbf16> to vector<8x128xf32>
    %121 = arith.truncf %111 : vector<8x32xf32> to vector<8x32xbf16>
    %cst_32 = arith.constant dense<0.000000e+00> : vector<8x128xf32>
    %122 = tpu.matmul %121, %3, %cst_32 {dimension_numbers = #tpu.dot_dimension_numbers<[1], [0], [0], [1], [0, 0, 1, 1], [], []>} : vector<8x32xbf16>, vector<32x128xbf16>, vector<8x128xf32> -> vector<8x128xf32>
    %123 = arith.addf %120, %122 : vector<8x128xf32>
    %124 = vector.extract_strided_slice %123 {offsets = [0, 0], sizes = [8, 32], strides = [1, 1]} : vector<8x128xf32> to vector<8x32xf32>
    %125 = arith.negf %124 : vector<8x32xf32>
    %126 = math.exp %125 : vector<8x32xf32>
    %cst_33 = arith.constant 1.000000e+00 : f32
    %127 = vector.broadcast %cst_33 : f32 to vector<8x32xf32>
    %128 = arith.addf %127, %126 : vector<8x32xf32>
    %129 = arith.divf %127, %128 : vector<8x32xf32>
    %130 = vector.extract_strided_slice %123 {offsets = [0, 32], sizes = [8, 32], strides = [1, 1]} : vector<8x128xf32> to vector<8x32xf32>
    %131 = arith.negf %130 : vector<8x32xf32>
    %132 = math.exp %131 : vector<8x32xf32>
    %cst_34 = arith.constant 1.000000e+00 : f32
    %133 = vector.broadcast %cst_34 : f32 to vector<8x32xf32>
    %134 = arith.addf %133, %132 : vector<8x32xf32>
    %135 = arith.divf %133, %134 : vector<8x32xf32>
    %136 = vector.extract_strided_slice %123 {offsets = [0, 64], sizes = [8, 32], strides = [1, 1]} : vector<8x128xf32> to vector<8x32xf32>
    %137 = math.tanh %136 : vector<8x32xf32>
    %138 = vector.extract_strided_slice %123 {offsets = [0, 96], sizes = [8, 32], strides = [1, 1]} : vector<8x128xf32> to vector<8x32xf32>
    %139 = arith.negf %138 : vector<8x32xf32>
    %140 = math.exp %139 : vector<8x32xf32>
    %cst_35 = arith.constant 1.000000e+00 : f32
    %141 = vector.broadcast %cst_35 : f32 to vector<8x32xf32>
    %142 = arith.addf %141, %140 : vector<8x32xf32>
    %143 = arith.divf %141, %142 : vector<8x32xf32>
    %144 = arith.mulf %135, %109 : vector<8x32xf32>
    %145 = arith.mulf %129, %137 : vector<8x32xf32>
    %146 = arith.addf %144, %145 : vector<8x32xf32>
    %147 = math.tanh %146 : vector<8x32xf32>
    %148 = arith.mulf %143, %147 : vector<8x32xf32>
    %149 = arith.truncf %148 : vector<8x32xf32> to vector<8x32xbf16>
    %150 = arith.index_cast %c3_i32 : i32 to index
    %c0_36 = arith.constant 0 : index
    %c0_37 = arith.constant 0 : index
    %151 = vector.load %arg6[%150, %c0_36, %c0_37] : memref<8x8x32xbf16, #tpu.memory_space<vmem>>, vector<1x8x32xbf16>
    %152 = vector.shape_cast %151 : vector<1x8x32xbf16> to vector<8x32xbf16>
    %153 = vector.shape_cast %149 : vector<8x32xbf16> to vector<1x8x32xbf16>
    tpu.vector_store %arg6[%150, %c0_36, %c0_37], %153 {strides = array<i32>} : memref<8x8x32xbf16, #tpu.memory_space<vmem>>, vector<1x8x32xbf16>,
    %c4_i32 = arith.constant 4 : i32
    %154 = arith.index_cast %c4_i32 : i32 to index
    %c0_38 = arith.constant 0 : index
    %c0_39 = arith.constant 0 : index
    %155 = vector.load %arg2[%154, %c0_38, %c0_39] : memref<8x8x128xbf16, #tpu.memory_space<vmem>>, vector<1x8x128xbf16>
    %156 = vector.shape_cast %155 : vector<1x8x128xbf16> to vector<8x128xbf16>
    %157 = arith.extf %156 : vector<8x128xbf16> to vector<8x128xf32>
    %158 = arith.truncf %148 : vector<8x32xf32> to vector<8x32xbf16>
    %cst_40 = arith.constant dense<0.000000e+00> : vector<8x128xf32>
    %159 = tpu.matmul %158, %3, %cst_40 {dimension_numbers = #tpu.dot_dimension_numbers<[1], [0], [0], [1], [0, 0, 1, 1], [], []>} : vector<8x32xbf16>, vector<32x128xbf16>, vector<8x128xf32> -> vector<8x128xf32>
    %160 = arith.addf %157, %159 : vector<8x128xf32>
    %161 = vector.extract_strided_slice %160 {offsets = [0, 0], sizes = [8, 32], strides = [1, 1]} : vector<8x128xf32> to vector<8x32xf32>
    %162 = arith.negf %161 : vector<8x32xf32>
    %163 = math.exp %162 : vector<8x32xf32>
    %cst_41 = arith.constant 1.000000e+00 : f32
    %164 = vector.broadcast %cst_41 : f32 to vector<8x32xf32>
    %165 = arith.addf %164, %163 : vector<8x32xf32>
    %166 = arith.divf %164, %165 : vector<8x32xf32>
    %167 = vector.extract_strided_slice %160 {offsets = [0, 32], sizes = [8, 32], strides = [1, 1]} : vector<8x128xf32> to vector<8x32xf32>
    %168 = arith.negf %167 : vector<8x32xf32>
    %169 = math.exp %168 : vector<8x32xf32>
    %cst_42 = arith.constant 1.000000e+00 : f32
    %170 = vector.broadcast %cst_42 : f32 to vector<8x32xf32>
    %171 = arith.addf %170, %169 : vector<8x32xf32>
    %172 = arith.divf %170, %171 : vector<8x32xf32>
    %173 = vector.extract_strided_slice %160 {offsets = [0, 64], sizes = [8, 32], strides = [1, 1]} : vector<8x128xf32> to vector<8x32xf32>
    %174 = math.tanh %173 : vector<8x32xf32>
    %175 = vector.extract_strided_slice %160 {offsets = [0, 96], sizes = [8, 32], strides = [1, 1]} : vector<8x128xf32> to vector<8x32xf32>
    %176 = arith.negf %175 : vector<8x32xf32>
    %177 = math.exp %176 : vector<8x32xf32>
    %cst_43 = arith.constant 1.000000e+00 : f32
    %178 = vector.broadcast %cst_43 : f32 to vector<8x32xf32>
    %179 = arith.addf %178, %177 : vector<8x32xf32>
    %180 = arith.divf %178, %179 : vector<8x32xf32>
    %181 = arith.mulf %172, %146 : vector<8x32xf32>
    %182 = arith.mulf %166, %174 : vector<8x32xf32>
    %183 = arith.addf %181, %182 : vector<8x32xf32>
    %184 = math.tanh %183 : vector<8x32xf32>
    %185 = arith.mulf %180, %184 : vector<8x32xf32>
    %186 = arith.truncf %185 : vector<8x32xf32> to vector<8x32xbf16>
    %187 = arith.index_cast %c4_i32 : i32 to index
    %c0_44 = arith.constant 0 : index
    %c0_45 = arith.constant 0 : index
    %188 = vector.load %arg6[%187, %c0_44, %c0_45] : memref<8x8x32xbf16, #tpu.memory_space<vmem>>, vector<1x8x32xbf16>
    %189 = vector.shape_cast %188 : vector<1x8x32xbf16> to vector<8x32xbf16>
    %190 = vector.shape_cast %186 : vector<8x32xbf16> to vector<1x8x32xbf16>
    tpu.vector_store %arg6[%187, %c0_44, %c0_45], %190 {strides = array<i32>} : memref<8x8x32xbf16, #tpu.memory_space<vmem>>, vector<1x8x32xbf16>,
    %c5_i32 = arith.constant 5 : i32
    %191 = arith.index_cast %c5_i32 : i32 to index
    %c0_46 = arith.constant 0 : index
    %c0_47 = arith.constant 0 : index
    %192 = vector.load %arg2[%191, %c0_46, %c0_47] : memref<8x8x128xbf16, #tpu.memory_space<vmem>>, vector<1x8x128xbf16>
    %193 = vector.shape_cast %192 : vector<1x8x128xbf16> to vector<8x128xbf16>
    %194 = arith.extf %193 : vector<8x128xbf16> to vector<8x128xf32>
    %195 = arith.truncf %185 : vector<8x32xf32> to vector<8x32xbf16>
    %cst_48 = arith.constant dense<0.000000e+00> : vector<8x128xf32>
    %196 = tpu.matmul %195, %3, %cst_48 {dimension_numbers = #tpu.dot_dimension_numbers<[1], [0], [0], [1], [0, 0, 1, 1], [], []>} : vector<8x32xbf16>, vector<32x128xbf16>, vector<8x128xf32> -> vector<8x128xf32>
    %197 = arith.addf %194, %196 : vector<8x128xf32>
    %198 = vector.extract_strided_slice %197 {offsets = [0, 0], sizes = [8, 32], strides = [1, 1]} : vector<8x128xf32> to vector<8x32xf32>
    %199 = arith.negf %198 : vector<8x32xf32>
    %200 = math.exp %199 : vector<8x32xf32>
    %cst_49 = arith.constant 1.000000e+00 : f32
    %201 = vector.broadcast %cst_49 : f32 to vector<8x32xf32>
    %202 = arith.addf %201, %200 : vector<8x32xf32>
    %203 = arith.divf %201, %202 : vector<8x32xf32>
    %204 = vector.extract_strided_slice %197 {offsets = [0, 32], sizes = [8, 32], strides = [1, 1]} : vector<8x128xf32> to vector<8x32xf32>
    %205 = arith.negf %204 : vector<8x32xf32>
    %206 = math.exp %205 : vector<8x32xf32>
    %cst_50 = arith.constant 1.000000e+00 : f32
    %207 = vector.broadcast %cst_50 : f32 to vector<8x32xf32>
    %208 = arith.addf %207, %206 : vector<8x32xf32>
    %209 = arith.divf %207, %208 : vector<8x32xf32>
    %210 = vector.extract_strided_slice %197 {offsets = [0, 64], sizes = [8, 32], strides = [1, 1]} : vector<8x128xf32> to vector<8x32xf32>
    %211 = math.tanh %210 : vector<8x32xf32>
    %212 = vector.extract_strided_slice %197 {offsets = [0, 96], sizes = [8, 32], strides = [1, 1]} : vector<8x128xf32> to vector<8x32xf32>
    %213 = arith.negf %212 : vector<8x32xf32>
    %214 = math.exp %213 : vector<8x32xf32>
    %cst_51 = arith.constant 1.000000e+00 : f32
    %215 = vector.broadcast %cst_51 : f32 to vector<8x32xf32>
    %216 = arith.addf %215, %214 : vector<8x32xf32>
    %217 = arith.divf %215, %216 : vector<8x32xf32>
    %218 = arith.mulf %209, %183 : vector<8x32xf32>
    %219 = arith.mulf %203, %211 : vector<8x32xf32>
    %220 = arith.addf %218, %219 : vector<8x32xf32>
    %221 = math.tanh %220 : vector<8x32xf32>
    %222 = arith.mulf %217, %221 : vector<8x32xf32>
    %223 = arith.truncf %222 : vector<8x32xf32> to vector<8x32xbf16>
    %224 = arith.index_cast %c5_i32 : i32 to index
    %c0_52 = arith.constant 0 : index
    %c0_53 = arith.constant 0 : index
    %225 = vector.load %arg6[%224, %c0_52, %c0_53] : memref<8x8x32xbf16, #tpu.memory_space<vmem>>, vector<1x8x32xbf16>
    %226 = vector.shape_cast %225 : vector<1x8x32xbf16> to vector<8x32xbf16>
    %227 = vector.shape_cast %223 : vector<8x32xbf16> to vector<1x8x32xbf16>
    tpu.vector_store %arg6[%224, %c0_52, %c0_53], %227 {strides = array<i32>} : memref<8x8x32xbf16, #tpu.memory_space<vmem>>, vector<1x8x32xbf16>,
    %c6_i32 = arith.constant 6 : i32
    %228 = arith.index_cast %c6_i32 : i32 to index
    %c0_54 = arith.constant 0 : index
    %c0_55 = arith.constant 0 : index
    %229 = vector.load %arg2[%228, %c0_54, %c0_55] : memref<8x8x128xbf16, #tpu.memory_space<vmem>>, vector<1x8x128xbf16>
    %230 = vector.shape_cast %229 : vector<1x8x128xbf16> to vector<8x128xbf16>
    %231 = arith.extf %230 : vector<8x128xbf16> to vector<8x128xf32>
    %232 = arith.truncf %222 : vector<8x32xf32> to vector<8x32xbf16>
    %cst_56 = arith.constant dense<0.000000e+00> : vector<8x128xf32>
    %233 = tpu.matmul %232, %3, %cst_56 {dimension_numbers = #tpu.dot_dimension_numbers<[1], [0], [0], [1], [0, 0, 1, 1], [], []>} : vector<8x32xbf16>, vector<32x128xbf16>, vector<8x128xf32> -> vector<8x128xf32>
    %234 = arith.addf %231, %233 : vector<8x128xf32>
    %235 = vector.extract_strided_slice %234 {offsets = [0, 0], sizes = [8, 32], strides = [1, 1]} : vector<8x128xf32> to vector<8x32xf32>
    %236 = arith.negf %235 : vector<8x32xf32>
    %237 = math.exp %236 : vector<8x32xf32>
    %cst_57 = arith.constant 1.000000e+00 : f32
    %238 = vector.broadcast %cst_57 : f32 to vector<8x32xf32>
    %239 = arith.addf %238, %237 : vector<8x32xf32>
    %240 = arith.divf %238, %239 : vector<8x32xf32>
    %241 = vector.extract_strided_slice %234 {offsets = [0, 32], sizes = [8, 32], strides = [1, 1]} : vector<8x128xf32> to vector<8x32xf32>
    %242 = arith.negf %241 : vector<8x32xf32>
    %243 = math.exp %242 : vector<8x32xf32>
    %cst_58 = arith.constant 1.000000e+00 : f32
    %244 = vector.broadcast %cst_58 : f32 to vector<8x32xf32>
    %245 = arith.addf %244, %243 : vector<8x32xf32>
    %246 = arith.divf %244, %245 : vector<8x32xf32>
    %247 = vector.extract_strided_slice %234 {offsets = [0, 64], sizes = [8, 32], strides = [1, 1]} : vector<8x128xf32> to vector<8x32xf32>
    %248 = math.tanh %247 : vector<8x32xf32>
    %249 = vector.extract_strided_slice %234 {offsets = [0, 96], sizes = [8, 32], strides = [1, 1]} : vector<8x128xf32> to vector<8x32xf32>
    %250 = arith.negf %249 : vector<8x32xf32>
    %251 = math.exp %250 : vector<8x32xf32>
    %cst_59 = arith.constant 1.000000e+00 : f32
    %252 = vector.broadcast %cst_59 : f32 to vector<8x32xf32>
    %253 = arith.addf %252, %251 : vector<8x32xf32>
    %254 = arith.divf %252, %253 : vector<8x32xf32>
    %255 = arith.mulf %246, %220 : vector<8x32xf32>
    %256 = arith.mulf %240, %248 : vector<8x32xf32>
    %257 = arith.addf %255, %256 : vector<8x32xf32>
    %258 = math.tanh %257 : vector<8x32xf32>
    %259 = arith.mulf %254, %258 : vector<8x32xf32>
    %260 = arith.truncf %259 : vector<8x32xf32> to vector<8x32xbf16>
    %261 = arith.index_cast %c6_i32 : i32 to index
    %c0_60 = arith.constant 0 : index
    %c0_61 = arith.constant 0 : index
    %262 = vector.load %arg6[%261, %c0_60, %c0_61] : memref<8x8x32xbf16, #tpu.memory_space<vmem>>, vector<1x8x32xbf16>
    %263 = vector.shape_cast %262 : vector<1x8x32xbf16> to vector<8x32xbf16>
    %264 = vector.shape_cast %260 : vector<8x32xbf16> to vector<1x8x32xbf16>
    tpu.vector_store %arg6[%261, %c0_60, %c0_61], %264 {strides = array<i32>} : memref<8x8x32xbf16, #tpu.memory_space<vmem>>, vector<1x8x32xbf16>,
    %c7_i32 = arith.constant 7 : i32
    %265 = arith.index_cast %c7_i32 : i32 to index
    %c0_62 = arith.constant 0 : index
    %c0_63 = arith.constant 0 : index
    %266 = vector.load %arg2[%265, %c0_62, %c0_63] : memref<8x8x128xbf16, #tpu.memory_space<vmem>>, vector<1x8x128xbf16>
    %267 = vector.shape_cast %266 : vector<1x8x128xbf16> to vector<8x128xbf16>
    %268 = arith.extf %267 : vector<8x128xbf16> to vector<8x128xf32>
    %269 = arith.truncf %259 : vector<8x32xf32> to vector<8x32xbf16>
    %cst_64 = arith.constant dense<0.000000e+00> : vector<8x128xf32>
    %270 = tpu.matmul %269, %3, %cst_64 {dimension_numbers = #tpu.dot_dimension_numbers<[1], [0], [0], [1], [0, 0, 1, 1], [], []>} : vector<8x32xbf16>, vector<32x128xbf16>, vector<8x128xf32> -> vector<8x128xf32>
    %271 = arith.addf %268, %270 : vector<8x128xf32>
    %272 = vector.extract_strided_slice %271 {offsets = [0, 0], sizes = [8, 32], strides = [1, 1]} : vector<8x128xf32> to vector<8x32xf32>
    %273 = arith.negf %272 : vector<8x32xf32>
    %274 = math.exp %273 : vector<8x32xf32>
    %cst_65 = arith.constant 1.000000e+00 : f32
    %275 = vector.broadcast %cst_65 : f32 to vector<8x32xf32>
    %276 = arith.addf %275, %274 : vector<8x32xf32>
    %277 = arith.divf %275, %276 : vector<8x32xf32>
    %278 = vector.extract_strided_slice %271 {offsets = [0, 32], sizes = [8, 32], strides = [1, 1]} : vector<8x128xf32> to vector<8x32xf32>
    %279 = arith.negf %278 : vector<8x32xf32>
    %280 = math.exp %279 : vector<8x32xf32>
    %cst_66 = arith.constant 1.000000e+00 : f32
    %281 = vector.broadcast %cst_66 : f32 to vector<8x32xf32>
    %282 = arith.addf %281, %280 : vector<8x32xf32>
    %283 = arith.divf %281, %282 : vector<8x32xf32>
    %284 = vector.extract_strided_slice %271 {offsets = [0, 64], sizes = [8, 32], strides = [1, 1]} : vector<8x128xf32> to vector<8x32xf32>
    %285 = math.tanh %284 : vector<8x32xf32>
    %286 = vector.extract_strided_slice %271 {offsets = [0, 96], sizes = [8, 32], strides = [1, 1]} : vector<8x128xf32> to vector<8x32xf32>
    %287 = arith.negf %286 : vector<8x32xf32>
    %288 = math.exp %287 : vector<8x32xf32>
    %cst_67 = arith.constant 1.000000e+00 : f32
    %289 = vector.broadcast %cst_67 : f32 to vector<8x32xf32>
    %290 = arith.addf %289, %288 : vector<8x32xf32>
    %291 = arith.divf %289, %290 : vector<8x32xf32>
    %292 = arith.mulf %283, %257 : vector<8x32xf32>
    %293 = arith.mulf %277, %285 : vector<8x32xf32>
    %294 = arith.addf %292, %293 : vector<8x32xf32>
    %295 = math.tanh %294 : vector<8x32xf32>
    %296 = arith.mulf %291, %295 : vector<8x32xf32>
    %297 = arith.truncf %296 : vector<8x32xf32> to vector<8x32xbf16>
    %298 = arith.index_cast %c7_i32 : i32 to index
    %c0_68 = arith.constant 0 : index
    %c0_69 = arith.constant 0 : index
    %299 = vector.load %arg6[%298, %c0_68, %c0_69] : memref<8x8x32xbf16, #tpu.memory_space<vmem>>, vector<1x8x32xbf16>
    %300 = vector.shape_cast %299 : vector<1x8x32xbf16> to vector<8x32xbf16>
    %301 = vector.shape_cast %297 : vector<8x32xbf16> to vector<1x8x32xbf16>
    tpu.vector_store %arg6[%298, %c0_68, %c0_69], %301 {strides = array<i32>} : memref<8x8x32xbf16, #tpu.memory_space<vmem>>, vector<1x8x32xbf16>,
    %c8_i32 = arith.constant 8 : i32
    %c0_70 = arith.constant 0 : index
    %c0_71 = arith.constant 0 : index
    %302 = vector.load %arg9[%c0_70, %c0_71] : memref<8x32xf32, #tpu.memory_space<vmem>>, vector<8x32xf32>
    tpu.vector_store %arg9[%c0_70, %c0_71], %296 {strides = array<i32>} : memref<8x32xf32, #tpu.memory_space<vmem>>, vector<8x32xf32>,
    %c0_72 = arith.constant 0 : index
    %c0_73 = arith.constant 0 : index
    %303 = vector.load %arg10[%c0_72, %c0_73] : memref<8x32xf32, #tpu.memory_space<vmem>>, vector<8x32xf32>
    tpu.vector_store %arg10[%c0_72, %c0_73], %294 {strides = array<i32>} : memref<8x32xf32, #tpu.memory_space<vmem>>, vector<8x32xf32>,
    %c0_i32_74 = arith.constant 0 : i32
    %304 = arith.cmpi eq, %arg1, %c0_i32_74 : i32
    %305 = arith.extui %304 : i1 to i32
    %c0_i32_75 = arith.constant 0 : i32
    %306 = arith.cmpi ne, %305, %c0_i32_75 : i32
    scf.if %306 {
      %c0_76 = arith.constant 0 : index
      %c0_77 = arith.constant 0 : index
      %307 = vector.load %arg9[%c0_76, %c0_77] : memref<8x32xf32, #tpu.memory_space<vmem>>, vector<8x32xf32>
      %c0_78 = arith.constant 0 : index
      %c0_79 = arith.constant 0 : index
      %308 = vector.load %arg7[%c0_78, %c0_79] : memref<8x32xf32, #tpu.memory_space<vmem>>, vector<8x32xf32>
      tpu.vector_store %arg7[%c0_78, %c0_79], %307 {strides = array<i32>} : memref<8x32xf32, #tpu.memory_space<vmem>>, vector<8x32xf32>,
      %c0_80 = arith.constant 0 : index
      %c0_81 = arith.constant 0 : index
      %309 = vector.load %arg10[%c0_80, %c0_81] : memref<8x32xf32, #tpu.memory_space<vmem>>, vector<8x32xf32>
      %c0_82 = arith.constant 0 : index
      %c0_83 = arith.constant 0 : index
      %310 = vector.load %arg8[%c0_82, %c0_83] : memref<8x32xf32, #tpu.memory_space<vmem>>, vector<8x32xf32>
      tpu.vector_store %arg8[%c0_82, %c0_83], %309 {strides = array<i32>} : memref<8x32xf32, #tpu.memory_space<vmem>>, vector<8x32xf32>,
    } else {
    }
    return
  }
  func.func @transform_0(%arg0: i32, %arg1: i32) -> (i32, i32, i32) {
    %c0_i32 = arith.constant 0 : i32
    %c0_i32_0 = arith.constant 0 : i32
    return %arg1, %arg0, %c0_i32 : i32, i32, i32
  }
  func.func @transform_1(%arg0: i32, %arg1: i32) -> (i32, i32) {
    %c0_i32 = arith.constant 0 : i32
    %c0_i32_0 = arith.constant 0 : i32
    %c0_i32_1 = arith.constant 0 : i32
    return %c0_i32, %c0_i32_0 : i32, i32
  }
  func.func @transform_2(%arg0: i32, %arg1: i32) -> (i32, i32) {
    %c0_i32 = arith.constant 0 : i32
    %c0_i32_0 = arith.constant 0 : i32
    return %arg0, %c0_i32 : i32, i32
  }
  func.func @transform_3(%arg0: i32, %arg1: i32) -> (i32, i32) {
    %c0_i32 = arith.constant 0 : i32
    %c0_i32_0 = arith.constant 0 : i32
    return %arg0, %c0_i32 : i32, i32
  }
  func.func @transform_4(%arg0: i32, %arg1: i32) -> (i32, i32, i32) {
    %c0_i32 = arith.constant 0 : i32
    %c0_i32_0 = arith.constant 0 : i32
    return %arg1, %arg0, %c0_i32 : i32, i32, i32
  }
  func.func @transform_5(%arg0: i32, %arg1: i32) -> (i32, i32) {
    %c0_i32 = arith.constant 0 : i32
    %c0_i32_0 = arith.constant 0 : i32
    return %arg0, %c0_i32 : i32, i32
  }
  func.func @transform_6(%arg0: i32, %arg1: i32) -> (i32, i32) {
    %c0_i32 = arith.constant 0 : i32
    %c0_i32_0 = arith.constant 0 : i32
    return %arg0, %c0_i32 : i32, i32
  }
}

</mosaic_0001>

<bundles_post_ra>
// kernel: tpu_custom_call.1
= control target key start
LH: loop header
LB: loop body
LE: loop exit
PB: predicated region body
PF: predicated region fallthrough
CT: control target
= control target key end

     0   :  { %12 = vsyncpa [#allocation5], 0  ;;  %s1398_s0 = inlined_call_operand.hbm [shape: bf16[8,8,128], index: 0, kind: input, shape index: {}]   ;;  %s1399_s1 = inlined_call_operand.hbm [shape: bf16[32,128], index: 1, kind: input, shape index: {}]   ;;  %s1400_s2 = inlined_call_operand.hbm [shape: f32[8,32], index: 2, kind: input, shape index: {}]   ;;  %s1401_s3 = inlined_call_operand.hbm [shape: f32[8,32], index: 3, kind: input, shape index: {}]   ;;  %s1402_s4 = inlined_call_operand.hbm [shape: bf16[8,8,32], index: 4, kind: output, shape index: {0}]   ;;  %s1403_s5 = inlined_call_operand.hbm [shape: f32[8,32], index: 5, kind: output, shape index: {1}]   ;;  %s1404_s6 = inlined_call_operand.hbm [shape: f32[8,32], index: 6, kind: output, shape index: {2}]  }
   0x1   :  { %13 = vsyncpa [#allocation8], 0 }
   0x2   :  { %14 = vsyncpa [#allocation11], 0 }
   0x3   :  { %15 = vsyncpa [#allocation6], 0 }
   0x4   :  { %16 = vsyncpa [#allocation14], 0  ;;  %s1174_s21 = smov [#allocation7]   ;;  %s1175_s23 = smov [#allocation4]  }
   0x5   :  { %s34_s22 = sshll.u32 %s1174_s21, 4  ;;  %s22_s24 = sshll.u32 %s1175_s23, 4  ;;  %s35_s22 = int_to_ptr.vmem [resolvable:$true] %s34_s22  ;;  %s23_s24 = int_to_ptr.vmem [resolvable:$true] %s22_s24 }
   0x6   :  { %s1032_s25 = scalar_lea.vmem %s35_s22, 256  ;;  %p1037_p1 = scmp.lt.s32.totalorder %s35_s22, %s35_s22 }
   0x7   :  { %p1033_p0 = scmp.ne.s32.totalorder %s35_s22, %s1032_s25  ;;  %p1038_p2 = scmp.lt.s32.totalorder %s1032_s25, %s1032_s25 }
   0x9   :  { %p1039_p3 = por %p1038_p2, %p1037_p1 }
   0xb   :  { %p1040_p4 = pnand %p1039_p3, %p1033_p0 }
   0xd   :  { %1043 = shalt.err (!%p1040_p4)
}
   0xe   :  { %s1176_s26 = smov 64   ;;  %s1177_s27 = smov 4  }
   0xf   :  { %40 = dma.hbm_to_vmem [thread:$0]  %s1399_s1, 256, %s35_s22, [#allocation8], %s1176_s26, %s1176_s26, %s1177_s27  }
  0x10   :  { %s1052_s30 = scalar_lea.vmem %s23_s24, 512  ;;  %p1057_p6 = scmp.lt.s32.totalorder %s23_s24, %s23_s24 }
  0x11   :  { %p1053_p5 = scmp.ne.s32.totalorder %s23_s24, %s1052_s30  ;;  %p1058_p7 = scmp.lt.s32.totalorder %s1052_s30, %s1052_s30 }
  0x13   :  { %p1059_p8 = por %p1058_p7, %p1057_p6 }
  0x15   :  { %p1060_p9 = pnand %p1059_p8, %p1053_p5 }
  0x17   :  { %1063 = shalt.err (!%p1060_p9)
}
  0x18   :  { %28 = dma.hbm_to_vmem [thread:$0]  %s1398_s0, 512, %s23_s24, [#allocation5], %s1176_s26, %s1176_s26, %s1177_s27  }
  0x19   :  { %s1178_s9 = smov [#allocation9]   ;;  %s1179_s11 = smov [#allocation10]  }
  0x1a   :  { %s47_s10 = sshll.u32 %s1178_s9, 4  ;;  %s57_s12 = sshll.u32 %s1179_s11, 4  ;;  %s48_s10 = int_to_ptr.vmem [resolvable:$true] %s47_s10  ;;  %s58_s12 = int_to_ptr.vmem [resolvable:$true] %s57_s12 }
  0x1b   :  { %s1072_s1 = scalar_lea.vmem %s48_s10, 128  ;;  %p1077_p11 = scmp.lt.s32.totalorder %s48_s10, %s48_s10 }
  0x1c   :  { %p1073_p10 = scmp.ne.s32.totalorder %s48_s10, %s1072_s1  ;;  %p1078_p12 = scmp.lt.s32.totalorder %s1072_s1, %s1072_s1 }
  0x1e   :  { %p1079_p13 = por %p1078_p12, %p1077_p11 }
  0x20   :  { %p1080_p0 = pnand %p1079_p13, %p1073_p10 }
  0x22   :  { %1083 = shalt.err (!%p1080_p0)
}
  0x23   :  { %50 = dma.hbm_to_vmem [thread:$0]  %s1400_s2, 128, %s48_s10, [#allocation8]  }
  0x24   :  { %s1092_s15 = scalar_lea.vmem %s58_s12, 128  ;;  %p1097_p2 = scmp.lt.s32.totalorder %s58_s12, %s58_s12 }
  0x25   :  { %p1093_p1 = scmp.ne.s32.totalorder %s58_s12, %s1092_s15  ;;  %p1098_p3 = scmp.lt.s32.totalorder %s1092_s15, %s1092_s15 }
  0x27   :  { %p1099_p4 = por %p1098_p3, %p1097_p2 }
  0x29   :  { %p1100_p5 = pnand %p1099_p4, %p1093_p1 }
  0x2b   :  { %1103 = shalt.err (!%p1100_p5)
}
  0x2c   :  { %60 = dma.hbm_to_vmem [thread:$0]  %s1401_s3, 128, %s58_s12, [#allocation11]  }
  0x2d   :  { %1164 = dma.done.wait [#allocation5], 512  }
  0x2e   :  { %1165 = vsyncadd [#allocation5], 4294966784 }
  0x2f   :  { %1166 = dma.done.wait [#allocation8], 384  }
  0x30   :  { %1167 = vsyncadd [#allocation8], 4294966912 }
  0x31   :  { %1168 = dma.done.wait [#allocation11], 128  }
  0x32   :  { %1169 = vsyncadd [#allocation11], 4294967168  ;;  %v1180_v0 = vmov 0.0   ;;  %vm1181_vm0 = vmmov 0   ;;  %v1246_v1 = vld [vmem:[#allocation7 + $0x8] sm:$0xff]   ;;  %vm79_vm1 = vcmask 261120  }
  0x33   :  { %881 = vmatprep.subr.bf16.mxu0 %v1180_v0  ;;  %885 = vmatprep.mubr.msk.bf16.mxu0 %vm1181_vm0, %v1180_v0  ;;  %v1249_v2 = vld [vmem:[#allocation7] sm:$0xff]   ;;  %v78_v3 = vld [vmem:[#allocation9] sm:$0xff]  ;;  %v81_v6 = vld [vmem:[#allocation10] sm:$0xff]  ;;  %s1182_s2 = smov 32   ;;  %vm184_vm2 = vcmask 257024   ;;  %s1183_s3 = smov 96  }
  0x34   :  { %889 = vmatprep.subr.bf16.mxu1 %v1180_v0  ;;  %893 = vmatprep.mubr.msk.bf16.mxu1 %vm1181_vm0, %v1180_v0  ;;  %80 = vst.msk [vmem:[#allocation2] sm:$0xff] %vm79_vm1, %v78_v3  ;;  %82 = vst.msk [vmem:[#allocation3] sm:$0xff] %vm79_vm1, %v81_v6  ;;  %v89_v7 = vld [vmem:[#allocation4] sm:$0xff]   ;;  %v269_v52 = vld [vmem:[#allocation4 + $0x8] sm:$0xff]   ;;  %s1184_s17 = smov [#allocation13]   ;;  %s1185_s19 = smov [#allocation15]  }
  0x35   :  { %882 = vmatpush3.bf16.msra.mxu0 %v1246_v1  ;;  %890 = vmatpush3.bf16.msra.mxu1 %v1246_v1  ;;  %v90_v8 = vunpack.c.l.bf16 %v89_v7  ;;  %v188_v31 = vunpack.c.h.bf16 %v89_v7  ;;  %v270_v53 = vunpack.c.l.bf16 %v269_v52  ;;  %s795_s18 = sshll.u32 %s1184_s17, 4  ;;  %s805_s20 = sshll.u32 %s1185_s19, 4  ;;  %s796_s18 = int_to_ptr.vmem [resolvable:$true] %s795_s18  ;;  %s806_s20 = int_to_ptr.vmem [resolvable:$true] %s805_s20 }
  0x36   :  { %883 = vmatprep.subr.bf16.mxu0 %v1180_v0  ;;  %891 = vmatprep.subr.bf16.mxu1 %v1180_v0  ;;  %s1186_s21 = smov [#allocation12]   ;;  %s1104_s23 = scalar_lea.vmem %s796_s18, 128 }
  0x37   :  { %s782_s22 = sshll.u32 %s1186_s21, 4  ;;  %p1105_p6 = scmp.ne.s32.totalorder %s796_s18, %s1104_s23  ;;  %s1378_s22 = int_to_ptr.vmem [resolvable:$true] %s782_s22 }
  0x38   :  { %p1109_p7 = scmp.lt.s32.totalorder %s796_s18, %s796_s18  ;;  %p1110_p8 = scmp.lt.s32.totalorder %s1104_s23, %s1104_s23 }
  0x39   :  { %884 = vmatpush3.bf16.msra.mxu0 %v1249_v2  ;;  %892 = vmatpush3.bf16.msra.mxu1 %v1249_v2 }
  0x3a   :  { %897 = vmatprep.subr.bf16.mxu0 %v1180_v0  ;;  %905 = vmatprep.subr.bf16.mxu1 %v1180_v0  ;;  %p1111_p9 = por %p1110_p8, %p1109_p7 }
  0x3b   :  { %v87_v4 = vld [vmem:[#allocation2] sm:$0xff]  ;;  %v88_v15 = vld [vmem:[#allocation3] sm:$0xff] }
  0x3c   :  { %v91_v5 = vpack.c.bf16 %v87_v4, %v87_v4  ;;  %p1112_p10 = pnand %p1111_p9, %p1105_p6 }
  0x3e   :  { %886 = vmatmul.mubr.msk.bf16.vlgmr.msra.gmra.mxu0 %vm79_vm1, %v91_v5 }
  0x3f   :  { %898 = vmatpush3.bf16.msra.mxu0 %v1246_v1  ;;  %901 = vmatprep.mubr.msk.bf16.mxu0 %vm1181_vm0, %v1180_v0 }
  0x40   :  { %899 = vmatprep.subr.bf16.mxu0 %v1180_v0 }
  0x43   :  { %900 = vmatpush3.bf16.msra.mxu0 %v1249_v2 }
  0x44   :  { %913 = vmatprep.subr.bf16.mxu0 %v1180_v0 }
  0xfe   :  { %v142_v9 = vpop.f32.mrf.mxu0 }
  0xff   :  { %v148_v10 = vadd.f32 %v142_v9, %v90_v8 }
 0x100   :  { %v887_v11 = vpop.f32.mrf.mxu0 }
 0x101   :  { %960 = vtanh.f32 %v148_v10  ;;  %v826_v16 = vmul.f32 -1.442695, %v148_v10 }
 0x102   :  { %v145_v12 = vpop.f32.mrf.mxu0 }
 0x103   :  { %962 = vpow2.f32 %v826_v16 }
 0x104   :  { %v888_v13 = vpop.f32.mrf.mxu0 }
 0x105   :  { %v352_v13 = vunpack.c.h.bf16 %v269_v52 }
 0x10e   :  { %v961_v14 = vpop.eup %960 }
 0x10f   :  { %162 = vrot.lane.b32.xlu0 %v961_v14, %s1176_s26 }
 0x110   :  { %v963_v17 = vpop.eup %962 }
 0x111   :  { %v152_v18 = vadd.f32 1.0, %v963_v17 }
 0x113   :  { %157 = vrot.lane.b32.xlu0 %v88_v15, %s1182_s2  ;;  %964 = vrcp.f32 %v152_v18 }
 0x120   :  { %v965_v19 = vpop.eup %964 }
 0x181   :  { %v163_v20 = vpop.permute.xlu0 %162 }
 0x182   :  { %v165_v21 = vmul.f32 %v965_v19, %v163_v20 }
 0x184   :  { %167 = vrot.lane.b32.xlu1 %v165_v21, %s1182_s2 }
 0x185   :  { %v158_v22 = vpop.permute.xlu0 %157 }
 0x186   :  { %v160_v23 = vmul.f32 %v965_v19, %v158_v22 }
 0x1f6   :  { %v168_v24 = vpop.permute.xlu1 %167 }
 0x1f7   :  { %v170_v25 = vadd.f32 %v168_v24, %v160_v23 }
 0x1f9   :  { %966 = vtanh.f32 %v170_v25 }
 0x206   :  { %v967_v26 = vpop.eup %966 }
 0x207   :  { %173 = vrot.lane.b32.xlu1 %v967_v26, %s1176_s26 }
 0x279   :  { %v174_v27 = vpop.permute.xlu1 %173 }
 0x27a   :  { %v176_v28 = vmul.f32 %v965_v19, %v174_v27 }
 0x27c   :  { %v1271_v29 = vpack.c.bf16 %v176_v28, %v176_v28 }
 0x27e   :  { %189 = vrot.lane.b32.xlu0 %v1271_v29, %s1182_s2 }
 0x2f0   :  { %v190_v30 = vpop.permute.xlu0 %189 }
 0x2f1   :  { %894 = vmatmul.mubr.msk.bf16.vlgmr.msra.gmra.mxu1 %vm79_vm1, %v190_v30 }
 0x2f2   :  { %906 = vmatpush3.bf16.msra.mxu1 %v1246_v1  ;;  %909 = vmatprep.mubr.msk.bf16.mxu1 %vm1181_vm0, %v1180_v0 }
 0x2f3   :  { %907 = vmatprep.subr.bf16.mxu1 %v1180_v0 }
 0x2f6   :  { %908 = vmatpush3.bf16.msra.mxu1 %v1249_v2 }
 0x2f7   :  { %921 = vmatprep.subr.bf16.mxu1 %v1180_v0 }
 0x3b1   :  { %v228_v32 = vpop.f32.mrf.mxu1 }
 0x3b2   :  { %v234_v33 = vadd.f32 %v228_v32, %v188_v31 }
 0x3b3   :  { %v895_v34 = vpop.f32.mrf.mxu1 }
 0x3b4   :  { %968 = vtanh.f32 %v234_v33  ;;  %v829_v38 = vmul.f32 -1.442695, %v234_v33 }
 0x3b5   :  { %v231_v35 = vpop.f32.mrf.mxu1 }
 0x3b6   :  { %970 = vpow2.f32 %v829_v38  ;;  %v433_v35 = vld [vmem:[#allocation4 + $0x10] sm:$0xff]  }
 0x3b7   :  { %v896_v36 = vpop.f32.mrf.mxu1 }
 0x3b8   :  { %v434_v36 = vunpack.c.l.bf16 %v433_v35 }
 0x3c1   :  { %v969_v37 = vpop.eup %968 }
 0x3c2   :  { %244 = vrot.lane.b32.xlu1 %v969_v37, %s1176_s26 }
 0x3c3   :  { %v971_v39 = vpop.eup %970 }
 0x3c4   :  { %v238_v40 = vadd.f32 1.0, %v971_v39 }
 0x3c6   :  { %972 = vrcp.f32 %v238_v40 }
 0x3d3   :  { %v973_v41 = vpop.eup %972 }
 0x3d4   :  { %v242_v44 = vmul.f32 %v973_v41, %v170_v25 }
 0x434   :  { %v245_v42 = vpop.permute.xlu1 %244 }
 0x435   :  { %v247_v43 = vmul.f32 %v973_v41, %v245_v42 }
 0x437   :  { %249 = vrot.lane.b32.xlu0 %v247_v43, %s1182_s2 }
 0x4a9   :  { %v250_v45 = vpop.permute.xlu0 %249 }
 0x4aa   :  { %v252_v46 = vadd.f32 %v250_v45, %v242_v44 }
 0x4ac   :  { %974 = vtanh.f32 %v252_v46 }
 0x4b9   :  { %v975_v47 = vpop.eup %974 }
 0x4ba   :  { %255 = vrot.lane.b32.xlu1 %v975_v47, %s1176_s26 }
 0x52c   :  { %v256_v48 = vpop.permute.xlu1 %255 }
 0x52d   :  { %v258_v49 = vmul.f32 %v973_v41, %v256_v48 }
 0x52f   :  { %v1285_v50 = vpack.c.bf16 %v258_v49, %v258_v49 }
 0x531   :  { %271 = vrot.lane.b32.xlu0 %v1285_v50, %s1182_s2 }
 0x5a3   :  { %v272_v51 = vpop.permute.xlu0 %271 }
 0x5a4   :  { %902 = vmatmul.mubr.msk.bf16.vlgmr.msra.gmra.mxu0 %vm79_vm1, %v272_v51 }
 0x5a5   :  { %914 = vmatpush3.bf16.msra.mxu0 %v1246_v1  ;;  %917 = vmatprep.mubr.msk.bf16.mxu0 %vm1181_vm0, %v1180_v0 }
 0x5a6   :  { %915 = vmatprep.subr.bf16.mxu0 %v1180_v0 }
 0x5a9   :  { %916 = vmatpush3.bf16.msra.mxu0 %v1249_v2 }
 0x5aa   :  { %929 = vmatprep.subr.bf16.mxu0 %v1180_v0 }
 0x664   :  { %v310_v54 = vpop.f32.mrf.mxu0 }
 0x665   :  { %v316_v55 = vadd.f32 %v310_v54, %v270_v53 }
 0x666   :  { %v903_v56 = vpop.f32.mrf.mxu0 }
 0x667   :  { %976 = vtanh.f32 %v316_v55  ;;  %v832_v60 = vmul.f32 -1.442695, %v316_v55 }
 0x668   :  { %v313_v57 = vpop.f32.mrf.mxu0 }
 0x669   :  { %978 = vpow2.f32 %v832_v60 }
 0x66a   :  { %v904_v58 = vpop.f32.mrf.mxu0 }
 0x66b   :  { %v516_v58 = vunpack.c.h.bf16 %v433_v35 }
 0x674   :  { %v977_v59 = vpop.eup %976 }
 0x675   :  { %326 = vrot.lane.b32.xlu1 %v977_v59, %s1176_s26 }
 0x676   :  { %v979_v61 = vpop.eup %978 }
 0x677   :  { %v320_v62 = vadd.f32 1.0, %v979_v61 }
 0x679   :  { %980 = vrcp.f32 %v320_v62 }
 0x686   :  { %v981_v63 = vpop.eup %980 }
 0x687   :  { %v324_v5 = vmul.f32 %v981_v63, %v252_v46 }
 0x6e7   :  { %v327_v3 = vpop.permute.xlu1 %326 }
 0x6e8   :  { %v329_v4 = vmul.f32 %v981_v63, %v327_v3 }
 0x6ea   :  { %331 = vrot.lane.b32.xlu0 %v329_v4, %s1182_s2 }
 0x75c   :  { %v332_v6 = vpop.permute.xlu0 %331 }
 0x75d   :  { %v334_v7 = vadd.f32 %v332_v6, %v324_v5 }
 0x75f   :  { %982 = vtanh.f32 %v334_v7 }
 0x76c   :  { %v983_v8 = vpop.eup %982 }
 0x76d   :  { %337 = vrot.lane.b32.xlu1 %v983_v8, %s1176_s26 }
 0x7df   :  { %v338_v9 = vpop.permute.xlu1 %337 }
 0x7e0   :  { %v340_v10 = vmul.f32 %v981_v63, %v338_v9 }
 0x7e2   :  { %v1299_v11 = vpack.c.bf16 %v340_v10, %v340_v10 }
 0x7e4   :  { %353 = vrot.lane.b32.xlu0 %v1299_v11, %s1182_s2 }
 0x856   :  { %v354_v12 = vpop.permute.xlu0 %353 }
 0x857   :  { %910 = vmatmul.mubr.msk.bf16.vlgmr.msra.gmra.mxu1 %vm79_vm1, %v354_v12 }
 0x858   :  { %922 = vmatpush3.bf16.msra.mxu1 %v1246_v1  ;;  %925 = vmatprep.mubr.msk.bf16.mxu1 %vm1181_vm0, %v1180_v0 }
 0x859   :  { %923 = vmatprep.subr.bf16.mxu1 %v1180_v0 }
 0x85c   :  { %924 = vmatpush3.bf16.msra.mxu1 %v1249_v2 }
 0x85d   :  { %937 = vmatprep.subr.bf16.mxu1 %v1180_v0 }
 0x917   :  { %v392_v14 = vpop.f32.mrf.mxu1 }
 0x918   :  { %v398_v15 = vadd.f32 %v392_v14, %v352_v13 }
 0x919   :  { %v911_v16 = vpop.f32.mrf.mxu1 }
 0x91a   :  { %984 = vtanh.f32 %v398_v15  ;;  %v835_v20 = vmul.f32 -1.442695, %v398_v15  ;;  %v597_v16 = vld [vmem:[#allocation4 + $0x18] sm:$0xff]  }
 0x91b   :  { %v395_v17 = vpop.f32.mrf.mxu1 }
 0x91c   :  { %986 = vpow2.f32 %v835_v20  ;;  %v598_v17 = vunpack.c.l.bf16 %v597_v16 }
 0x91d   :  { %v912_v18 = vpop.f32.mrf.mxu1 }
 0x927   :  { %v985_v19 = vpop.eup %984 }
 0x928   :  { %408 = vrot.lane.b32.xlu1 %v985_v19, %s1176_s26 }
 0x929   :  { %v987_v21 = vpop.eup %986 }
 0x92a   :  { %v402_v22 = vadd.f32 1.0, %v987_v21 }
 0x92c   :  { %988 = vrcp.f32 %v402_v22 }
 0x939   :  { %v989_v23 = vpop.eup %988 }
 0x93a   :  { %v406_v26 = vmul.f32 %v989_v23, %v334_v7 }
 0x99a   :  { %v409_v24 = vpop.permute.xlu1 %408 }
 0x99b   :  { %v411_v25 = vmul.f32 %v989_v23, %v409_v24 }
 0x99d   :  { %413 = vrot.lane.b32.xlu0 %v411_v25, %s1182_s2 }
 0xa0f   :  { %v414_v27 = vpop.permute.xlu0 %413 }
 0xa10   :  { %v416_v28 = vadd.f32 %v414_v27, %v406_v26 }
 0xa12   :  { %990 = vtanh.f32 %v416_v28 }
 0xa1f   :  { %v991_v30 = vpop.eup %990 }
 0xa20   :  { %419 = vrot.lane.b32.xlu1 %v991_v30, %s1176_s26 }
 0xa92   :  { %v420_v31 = vpop.permute.xlu1 %419 }
 0xa93   :  { %v422_v32 = vmul.f32 %v989_v23, %v420_v31 }
 0xa95   :  { %v1313_v33 = vpack.c.bf16 %v422_v32, %v422_v32 }
 0xa97   :  { %435 = vrot.lane.b32.xlu0 %v1313_v33, %s1182_s2 }
 0xb09   :  { %v436_v34 = vpop.permute.xlu0 %435 }
 0xb0a   :  { %918 = vmatmul.mubr.msk.bf16.vlgmr.msra.gmra.mxu0 %vm79_vm1, %v436_v34 }
 0xb0b   :  { %930 = vmatpush3.bf16.msra.mxu0 %v1246_v1  ;;  %933 = vmatprep.mubr.msk.bf16.mxu0 %vm1181_vm0, %v1180_v0 }
 0xb0c   :  { %931 = vmatprep.subr.bf16.mxu0 %v1180_v0 }
 0xb0f   :  { %932 = vmatpush3.bf16.msra.mxu0 %v1249_v2 }
 0xbca   :  { %v474_v37 = vpop.f32.mrf.mxu0 }
 0xbcb   :  { %v480_v38 = vadd.f32 %v474_v37, %v434_v36 }
 0xbcc   :  { %v919_v39 = vpop.f32.mrf.mxu0 }
 0xbcd   :  { %992 = vtanh.f32 %v480_v38  ;;  %v838_v43 = vmul.f32 -1.442695, %v480_v38 }
 0xbce   :  { %v477_v40 = vpop.f32.mrf.mxu0 }
 0xbcf   :  { %994 = vpow2.f32 %v838_v43  ;;  %v680_v40 = vunpack.c.h.bf16 %v597_v16 }
 0xbd0   :  { %v920_v41 = vpop.f32.mrf.mxu0 }
 0xbda   :  { %v993_v42 = vpop.eup %992 }
 0xbdb   :  { %490 = vrot.lane.b32.xlu1 %v993_v42, %s1176_s26 }
 0xbdc   :  { %v995_v44 = vpop.eup %994 }
 0xbdd   :  { %v484_v45 = vadd.f32 1.0, %v995_v44 }
 0xbdf   :  { %996 = vrcp.f32 %v484_v45 }
 0xbec   :  { %v997_v46 = vpop.eup %996 }
 0xbed   :  { %v488_v49 = vmul.f32 %v997_v46, %v416_v28 }
 0xc4d   :  { %v491_v47 = vpop.permute.xlu1 %490 }
 0xc4e   :  { %v493_v48 = vmul.f32 %v997_v46, %v491_v47 }
 0xc50   :  { %495 = vrot.lane.b32.xlu0 %v493_v48, %s1182_s2 }
 0xcc2   :  { %v496_v51 = vpop.permute.xlu0 %495 }
 0xcc3   :  { %v498_v52 = vadd.f32 %v496_v51, %v488_v49 }
 0xcc5   :  { %998 = vtanh.f32 %v498_v52 }
 0xcd2   :  { %v999_v53 = vpop.eup %998 }
 0xcd3   :  { %501 = vrot.lane.b32.xlu1 %v999_v53, %s1176_s26 }
 0xd45   :  { %v502_v54 = vpop.permute.xlu1 %501 }
 0xd46   :  { %v504_v55 = vmul.f32 %v997_v46, %v502_v54 }
 0xd48   :  { %v1326_v56 = vpack.c.bf16 %v504_v55, %v504_v55 }
 0xd4a   :  { %517 = vrot.lane.b32.xlu0 %v1326_v56, %s1182_s2 }
 0xdbc   :  { %v518_v57 = vpop.permute.xlu0 %517 }
 0xdbd   :  { %926 = vmatmul.mubr.msk.bf16.vlgmr.msra.gmra.mxu1 %vm79_vm1, %v518_v57 }
 0xdbe   :  { %938 = vmatpush3.bf16.msra.mxu1 %v1246_v1  ;;  %941 = vmatprep.mubr.msk.bf16.mxu1 %vm1181_vm0, %v1180_v0 }
 0xdbf   :  { %939 = vmatprep.subr.bf16.mxu1 %v1180_v0 }
 0xdc2   :  { %940 = vmatpush3.bf16.msra.mxu1 %v1249_v2 }
 0xe7d   :  { %v556_v59 = vpop.f32.mrf.mxu1 }
 0xe7e   :  { %v562_v60 = vadd.f32 %v556_v59, %v516_v58 }
 0xe7f   :  { %v927_v61 = vpop.f32.mrf.mxu1 }
 0xe80   :  { %1000 = vtanh.f32 %v562_v60  ;;  %v841_v4 = vmul.f32 -1.442695, %v562_v60 }
 0xe81   :  { %v559_v62 = vpop.f32.mrf.mxu1 }
 0xe82   :  { %1002 = vpow2.f32 %v841_v4 }
 0xe83   :  { %v928_v63 = vpop.f32.mrf.mxu1 }
 0xe8d   :  { %v1001_v3 = vpop.eup %1000 }
 0xe8e   :  { %572 = vrot.lane.b32.xlu1 %v1001_v3, %s1176_s26 }
 0xe8f   :  { %v1003_v1 = vpop.eup %1002 }
 0xe90   :  { %v566_v5 = vadd.f32 1.0, %v1003_v1 }
 0xe92   :  { %1004 = vrcp.f32 %v566_v5 }
 0xe9f   :  { %v1005_v6 = vpop.eup %1004 }
 0xea0   :  { %v570_v2 = vmul.f32 %v1005_v6, %v498_v52 }
 0xf00   :  { %v573_v7 = vpop.permute.xlu1 %572 }
 0xf01   :  { %v575_v0 = vmul.f32 %v1005_v6, %v573_v7 }
 0xf03   :  { %577 = vrot.lane.b32.xlu0 %v575_v0, %s1182_s2 }
 0xf75   :  { %v578_v8 = vpop.permute.xlu0 %577 }
 0xf76   :  { %v580_v9 = vadd.f32 %v578_v8, %v570_v2 }
 0xf78   :  { %1006 = vtanh.f32 %v580_v9 }
 0xf85   :  { %v1007_v10 = vpop.eup %1006 }
 0xf86   :  { %583 = vrot.lane.b32.xlu1 %v1007_v10, %s1176_s26 }
 0xff8   :  { %v584_v12 = vpop.permute.xlu1 %583 }
 0xff9   :  { %v586_v13 = vmul.f32 %v1005_v6, %v584_v12 }
 0xffb   :  { %v1339_v14 = vpack.c.bf16 %v586_v13, %v586_v13 }
 0xffd   :  { %599 = vrot.lane.b32.xlu0 %v1339_v14, %s1182_s2 }
0x106f   :  { %v600_v15 = vpop.permute.xlu0 %599 }
0x1070   :  { %934 = vmatmul.mubr.msk.bf16.vlgmr.msra.gmra.mxu0 %vm79_vm1, %v600_v15 }
0x1130   :  { %v638_v18 = vpop.f32.mrf.mxu0 }
0x1131   :  { %v644_v19 = vadd.f32 %v638_v18, %v598_v17 }
0x1132   :  { %v935_v20 = vpop.f32.mrf.mxu0 }
0x1133   :  { %1008 = vtanh.f32 %v644_v19  ;;  %v844_v24 = vmul.f32 -1.442695, %v644_v19 }
0x1134   :  { %v641_v21 = vpop.f32.mrf.mxu0 }
0x1135   :  { %1010 = vpow2.f32 %v844_v24 }
0x1136   :  { %v936_v22 = vpop.f32.mrf.mxu0 }
0x1140   :  { %v1009_v23 = vpop.eup %1008 }
0x1141   :  { %654 = vrot.lane.b32.xlu1 %v1009_v23, %s1176_s26 }
0x1142   :  { %v1011_v25 = vpop.eup %1010 }
0x1143   :  { %v648_v26 = vadd.f32 1.0, %v1011_v25 }
0x1145   :  { %1012 = vrcp.f32 %v648_v26 }
0x1152   :  { %v1013_v27 = vpop.eup %1012 }
0x1153   :  { %v652_v31 = vmul.f32 %v1013_v27, %v580_v9 }
0x11b3   :  { %v655_v28 = vpop.permute.xlu1 %654 }
0x11b4   :  { %v657_v30 = vmul.f32 %v1013_v27, %v655_v28 }
0x11b6   :  { %659 = vrot.lane.b32.xlu0 %v657_v30, %s1182_s2 }
0x1228   :  { %v660_v32 = vpop.permute.xlu0 %659 }
0x1229   :  { %v662_v34 = vadd.f32 %v660_v32, %v652_v31 }
0x122b   :  { %1014 = vtanh.f32 %v662_v34 }
0x1238   :  { %v1015_v35 = vpop.eup %1014 }
0x1239   :  { %665 = vrot.lane.b32.xlu1 %v1015_v35, %s1176_s26 }
0x12ab   :  { %v666_v36 = vpop.permute.xlu1 %665 }
0x12ac   :  { %v668_v37 = vmul.f32 %v1013_v27, %v666_v36 }
0x12ae   :  { %v669_v38 = vpack.c.bf16 %v668_v37, %v668_v37 }
0x12b0   :  { %681 = vrot.lane.b32.xlu0 %v669_v38, %s1182_s2 }
0x1322   :  { %v682_v39 = vpop.permute.xlu0 %681 }
0x1323   :  { %942 = vmatmul.mubr.msk.bf16.vlgmr.msra.gmra.mxu1 %vm79_vm1, %v682_v39 }
0x13e3   :  { %v720_v41 = vpop.f32.mrf.mxu1 }
0x13e4   :  { %v726_v42 = vadd.f32 %v720_v41, %v680_v40 }
0x13e5   :  { %v943_v43 = vpop.f32.mrf.mxu1 }
0x13e6   :  { %1016 = vtanh.f32 %v726_v42  ;;  %v847_v47 = vmul.f32 -1.442695, %v726_v42 }
0x13e7   :  { %v723_v44 = vpop.f32.mrf.mxu1 }
0x13e8   :  { %1018 = vpow2.f32 %v847_v47 }
0x13e9   :  { %v944_v45 = vpop.f32.mrf.mxu1 }
0x13f3   :  { %v1017_v46 = vpop.eup %1016 }
0x13f4   :  { %736 = vrot.lane.b32.xlu1 %v1017_v46, %s1176_s26 }
0x13f5   :  { %v1019_v48 = vpop.eup %1018 }
0x13f6   :  { %v730_v49 = vadd.f32 1.0, %v1019_v48 }
0x13f8   :  { %1020 = vrcp.f32 %v730_v49 }
0x1405   :  { %v1021_v51 = vpop.eup %1020 }
0x1406   :  { %v734_v54 = vmul.f32 %v1021_v51, %v662_v34 }
0x1466   :  { %v737_v52 = vpop.permute.xlu1 %736 }
0x1467   :  { %v739_v53 = vmul.f32 %v1021_v51, %v737_v52 }
0x1469   :  { %741 = vrot.lane.b32.xlu0 %v739_v53, %s1182_s2 }
0x146d   :  { %181 = vrot.lane.b32.xlu0 %v1271_v29, %s1182_s2 }
0x14db   :  { %v742_v55 = vpop.permute.xlu0 %741 }
0x14dc   :  { %v744_v57 = vadd.f32 %v742_v55, %v734_v54 }
0x14de   :  { %1022 = vtanh.f32 %v744_v57 }
0x14df   :  { %v182_v58 = vpop.permute.xlu0 %181 }
0x14e0   :  { %185 = vst.msk [vmem:[#allocation12] sm:$0xf] %vm184_vm2, %v182_v58 }
0x14eb   :  { %v1023_v59 = vpop.eup %1022 }
0x14ec   :  { %747 = vrot.lane.b32.xlu1 %v1023_v59, %s1176_s26 }
0x14f0   :  { %766 = vrot.lane.b32.xlu1 %v744_v57, %s1183_s3 }
0x14f4   :  { %263 = vrot.lane.b32.xlu1 %v1285_v50, %s1182_s2 }
0x14f8   :  { %427 = vrot.lane.b32.xlu1 %v1313_v33, %s1182_s2 }
0x14fc   :  { %591 = vrot.lane.b32.xlu1 %v1339_v14, %s1182_s2 }
0x155e   :  { %v748_v29 = vpop.permute.xlu1 %747 }
0x155f   :  { %v750_v60 = vmul.f32 %v1021_v51, %v748_v29 }
0x1561   :  { %v856_v61 = vpack.c.bf16 %v750_v60, %v750_v60  ;;  %761 = vrot.lane.b32.xlu0 %v750_v60, %s1182_s2 }
0x1562   :  { %v767_v62 = vpop.permute.xlu1 %766 }
0x1563   :  { %769 = vst.msk [vmem:[#allocation3] sm:$0xff] %vm79_vm1, %v767_v62  ;;  %755 = vrot.lane.b32.xlu1 %v856_v61, %s1182_s2 }
0x1565   :  { %345 = vrot.lane.b32.xlu0 %v1299_v11, %s1182_s2 }
0x1566   :  { %v264_v50 = vpop.permute.xlu1 %263 }
0x1567   :  { %267 = vst.msk [vmem:[#allocation12 + $0x4] sm:$0xf] %vm184_vm2, %v264_v50 }
0x1569   :  { %509 = vrot.lane.b32.xlu0 %v1326_v56, %s1182_s2 }
0x156a   :  { %v428_v33 = vpop.permute.xlu1 %427  ;;  %v775_v63 = vld [vmem:[#allocation3] sm:$0xff] }
0x156b   :  { %431 = vst.msk [vmem:[#allocation12 + $0xc] sm:$0xf] %vm184_vm2, %v428_v33 }
0x156c   :  { %776 = vst.msk [vmem:[#allocation15] sm:$0xff] %vm79_vm1, %v775_v63 }
0x156d   :  { %673 = vrot.lane.b32.xlu0 %v669_v38, %s1182_s2 }
0x156e   :  { %v592_v3 = vpop.permute.xlu1 %591 }
0x156f   :  { %595 = vst.msk [vmem:[#allocation12 + $0x14] sm:$0xf] %vm184_vm2, %v592_v3 }
0x15d3   :  { %v762_v4 = vpop.permute.xlu0 %761 }
0x15d4   :  { %764 = vst.msk [vmem:[#allocation2] sm:$0xff] %vm79_vm1, %v762_v4 }
0x15d5   :  { %v756_v11 = vpop.permute.xlu1 %755 }
0x15d6   :  { %759 = vst.msk [vmem:[#allocation12 + $0x1c] sm:$0xf] %vm184_vm2, %v756_v11 }
0x15d7   :  { %v346_v1 = vpop.permute.xlu0 %345 }
0x15d8   :  { %349 = vst.msk [vmem:[#allocation12 + $0x8] sm:$0xf] %vm184_vm2, %v346_v1 }
0x15db   :  { %v510_v56 = vpop.permute.xlu0 %509  ;;  %v773_v5 = vld [vmem:[#allocation2] sm:$0xff] }
0x15dc   :  { %513 = vst.msk [vmem:[#allocation12 + $0x10] sm:$0xf] %vm184_vm2, %v510_v56 }
0x15dd   :  { %774 = vst.msk [vmem:[#allocation13] sm:$0xff] %vm79_vm1, %v773_v5 }
0x15de   :  { %1115 = shalt.err (!%p1112_p10)
}
0x15df   :  { %798 = dma.vmem_to_hbm [thread:$0]  %s796_s18, 128, %s1403_s5, [#allocation14]  }
0x15e0   :  { %s1124_s28 = scalar_lea.vmem %s806_s20, 128  ;;  %p1129_p12 = scmp.lt.s32.totalorder %s806_s20, %s806_s20 }
0x15e1   :  { %p1125_p11 = scmp.ne.s32.totalorder %s806_s20, %s1124_s28  ;;  %p1130_p13 = scmp.lt.s32.totalorder %s1124_s28, %s1124_s28 }
0x15e3   :  { %p1131_p0 = por %p1130_p13, %p1129_p12 }
0x15e5   :  { %p1132_p1 = pnand %p1131_p0, %p1125_p11 }
0x15e7   :  { %1135 = shalt.err (!%p1132_p1)
}
0x15e8   :  { %808 = dma.vmem_to_hbm [thread:$0]  %s806_s20, 128, %s1404_s6, [#allocation14]   ;;  %v674_v6 = vpop.permute.xlu0 %673 }
0x15e9   :  { %677 = vst.msk [vmem:[#allocation12 + $0x18] sm:$0xf] %vm184_vm2, %v674_v6  ;;  %s1144_s7 = scalar_lea.vmem %s1378_s22, 512  ;;  %p1149_p3 = scmp.lt.s32.totalorder %s1378_s22, %s1378_s22 }
0x15ea   :  { %p1145_p2 = scmp.ne.s32.totalorder %s1378_s22, %s1144_s7  ;;  %p1150_p4 = scmp.lt.s32.totalorder %s1144_s7, %s1144_s7 }
0x15ec   :  { %p1151_p5 = por %p1150_p4, %p1149_p3 }
0x15ee   :  { %p1152_p6 = pnand %p1151_p5, %p1145_p2 }
0x15f0   :  { %1155 = shalt.err (!%p1152_p6)
}
0x15f1   :  { %788 = dma.vmem_to_hbm [thread:$0]  %s1378_s22, 512, %s1402_s4, [#allocation6], %s1176_s26, %s1176_s26, %s1177_s27  }
0x15f2   :  { %1170 = dma.done.wait [#allocation6], 512  }
0x15f3   :  { %1171 = vsyncadd [#allocation6], 4294966784 }
0x15f4   :  { %1172 = dma.done.wait [#allocation14], 256  }
0x15f5   :  { %1173 = vsyncadd [#allocation14], 4294967040 }
0x15f6   :  { %818 = vsyncpa [#allocation5], 1 }
0x15f7   :  { %819 = vsyncpa [#allocation8], 1 }
0x15f8   :  { %820 = vsyncpa [#allocation11], 1 }
0x15f9   :  { %821 = vsyncpa [#allocation6], 1 }
0x15fa   :  { %822 = vsyncpa [#allocation14], 1 }

// kernel: tpu_custom_call.1
= control target key start
LH: loop header
LB: loop body
LE: loop exit
PB: predicated region body
PF: predicated region fallthrough
CT: control target
= control target key end

     0   :  { %12 = vsyncpa [#allocation5], 0  ;;  %s1398_s0 = inlined_call_operand.hbm [shape: bf16[8,8,128], index: 0, kind: input, shape index: {}]   ;;  %s1399_s1 = inlined_call_operand.hbm [shape: bf16[32,128], index: 1, kind: input, shape index: {}]   ;;  %s1400_s2 = inlined_call_operand.hbm [shape: f32[8,32], index: 2, kind: input, shape index: {}]   ;;  %s1401_s3 = inlined_call_operand.hbm [shape: f32[8,32], index: 3, kind: input, shape index: {}]   ;;  %s1402_s4 = inlined_call_operand.hbm [shape: bf16[8,8,32], index: 4, kind: output, shape index: {0}]   ;;  %s1403_s5 = inlined_call_operand.hbm [shape: f32[8,32], index: 5, kind: output, shape index: {1}]   ;;  %s1404_s6 = inlined_call_operand.hbm [shape: f32[8,32], index: 6, kind: output, shape index: {2}]  }
   0x1   :  { %13 = vsyncpa [#allocation8], 0 }
   0x2   :  { %14 = vsyncpa [#allocation11], 0 }
   0x3   :  { %15 = vsyncpa [#allocation6], 0 }
   0x4   :  { %16 = vsyncpa [#allocation14], 0  ;;  %s1174_s21 = smov [#allocation7]   ;;  %s1175_s23 = smov [#allocation4]  }
   0x5   :  { %s34_s22 = sshll.u32 %s1174_s21, 4  ;;  %s22_s24 = sshll.u32 %s1175_s23, 4  ;;  %s35_s22 = int_to_ptr.vmem [resolvable:$true] %s34_s22  ;;  %s23_s24 = int_to_ptr.vmem [resolvable:$true] %s22_s24 }
   0x6   :  { %s1032_s25 = scalar_lea.vmem %s35_s22, 256  ;;  %p1037_p1 = scmp.lt.s32.totalorder %s35_s22, %s35_s22 }
   0x7   :  { %p1033_p0 = scmp.ne.s32.totalorder %s35_s22, %s1032_s25  ;;  %p1038_p2 = scmp.lt.s32.totalorder %s1032_s25, %s1032_s25 }
   0x9   :  { %p1039_p3 = por %p1038_p2, %p1037_p1 }
   0xb   :  { %p1040_p4 = pnand %p1039_p3, %p1033_p0 }
   0xd   :  { %1043 = shalt.err (!%p1040_p4)
}
   0xe   :  { %s1176_s26 = smov 64   ;;  %s1177_s27 = smov 4  }
   0xf   :  { %40 = dma.hbm_to_vmem [thread:$0]  %s1399_s1, 256, %s35_s22, [#allocation8], %s1176_s26, %s1176_s26, %s1177_s27  }
  0x10   :  { %s1052_s30 = scalar_lea.vmem %s23_s24, 512  ;;  %p1057_p6 = scmp.lt.s32.totalorder %s23_s24, %s23_s24 }
  0x11   :  { %p1053_p5 = scmp.ne.s32.totalorder %s23_s24, %s1052_s30  ;;  %p1058_p7 = scmp.lt.s32.totalorder %s1052_s30, %s1052_s30 }
  0x13   :  { %p1059_p8 = por %p1058_p7, %p1057_p6 }
  0x15   :  { %p1060_p9 = pnand %p1059_p8, %p1053_p5 }
  0x17   :  { %1063 = shalt.err (!%p1060_p9)
}
  0x18   :  { %28 = dma.hbm_to_vmem [thread:$0]  %s1398_s0, 512, %s23_s24, [#allocation5], %s1176_s26, %s1176_s26, %s1177_s27  }
  0x19   :  { %s1178_s9 = smov [#allocation9]   ;;  %s1179_s11 = smov [#allocation10]  }
  0x1a   :  { %s47_s10 = sshll.u32 %s1178_s9, 4  ;;  %s57_s12 = sshll.u32 %s1179_s11, 4  ;;  %s48_s10 = int_to_ptr.vmem [resolvable:$true] %s47_s10  ;;  %s58_s12 = int_to_ptr.vmem [resolvable:$true] %s57_s12 }
  0x1b   :  { %s1072_s1 = scalar_lea.vmem %s48_s10, 128  ;;  %p1077_p11 = scmp.lt.s32.totalorder %s48_s10, %s48_s10 }
  0x1c   :  { %p1073_p10 = scmp.ne.s32.totalorder %s48_s10, %s1072_s1  ;;  %p1078_p12 = scmp.lt.s32.totalorder %s1072_s1, %s1072_s1 }
  0x1e   :  { %p1079_p13 = por %p1078_p12, %p1077_p11 }
  0x20   :  { %p1080_p0 = pnand %p1079_p13, %p1073_p10 }
  0x22   :  { %1083 = shalt.err (!%p1080_p0)
}
  0x23   :  { %50 = dma.hbm_to_vmem [thread:$0]  %s1400_s2, 128, %s48_s10, [#allocation8]  }
  0x24   :  { %s1092_s15 = scalar_lea.vmem %s58_s12, 128  ;;  %p1097_p2 = scmp.lt.s32.totalorder %s58_s12, %s58_s12 }
  0x25   :  { %p1093_p1 = scmp.ne.s32.totalorder %s58_s12, %s1092_s15  ;;  %p1098_p3 = scmp.lt.s32.totalorder %s1092_s15, %s1092_s15 }
  0x27   :  { %p1099_p4 = por %p1098_p3, %p1097_p2 }
  0x29   :  { %p1100_p5 = pnand %p1099_p4, %p1093_p1 }
  0x2b   :  { %1103 = shalt.err (!%p1100_p5)
}
  0x2c   :  { %60 = dma.hbm_to_vmem [thread:$0]  %s1401_s3, 128, %s58_s12, [#allocation11]  }
  0x2d   :  { %1164 = dma.done.wait [#allocation5], 512  }
  0x2e   :  { %1165 = vsyncadd [#allocation5], 4294966784 }
  0x2f   :  { %1166 = dma.done.wait [#allocation8], 384  }
  0x30   :  { %1167 = vsyncadd [#allocation8], 4294966912 }
  0x31   :  { %1168 = dma.done.wait [#allocation11], 128  }
  0x32   :  { %1169 = vsyncadd [#allocation11], 4294967168  ;;  %v1180_v0 = vmov 0.0   ;;  %vm1181_vm0 = vmmov 0   ;;  %v1246_v1 = vld [vmem:[#allocation7 + $0x8] sm:$0xff]   ;;  %vm79_vm1 = vcmask 261120  }
  0x33   :  { %881 = vmatprep.subr.bf16.mxu0 %v1180_v0  ;;  %885 = vmatprep.mubr.msk.bf16.mxu0 %vm1181_vm0, %v1180_v0  ;;  %v1249_v2 = vld [vmem:[#allocation7] sm:$0xff]   ;;  %v78_v3 = vld [vmem:[#allocation9] sm:$0xff]  ;;  %v81_v6 = vld [vmem:[#allocation10] sm:$0xff]  ;;  %s1182_s2 = smov 32   ;;  %vm184_vm2 = vcmask 257024   ;;  %s1183_s3 = smov 96  }
  0x34   :  { %889 = vmatprep.subr.bf16.mxu1 %v1180_v0  ;;  %893 = vmatprep.mubr.msk.bf16.mxu1 %vm1181_vm0, %v1180_v0  ;;  %80 = vst.msk [vmem:[#allocation2] sm:$0xff] %vm79_vm1, %v78_v3  ;;  %82 = vst.msk [vmem:[#allocation3] sm:$0xff] %vm79_vm1, %v81_v6  ;;  %v89_v7 = vld [vmem:[#allocation4] sm:$0xff]   ;;  %v269_v52 = vld [vmem:[#allocation4 + $0x8] sm:$0xff]   ;;  %s1184_s17 = smov [#allocation13]   ;;  %s1185_s19 = smov [#allocation15]  }
  0x35   :  { %882 = vmatpush3.bf16.msra.mxu0 %v1246_v1  ;;  %890 = vmatpush3.bf16.msra.mxu1 %v1246_v1  ;;  %v90_v8 = vunpack.c.l.bf16 %v89_v7  ;;  %v188_v31 = vunpack.c.h.bf16 %v89_v7  ;;  %v270_v53 = vunpack.c.l.bf16 %v269_v52  ;;  %s795_s18 = sshll.u32 %s1184_s17, 4  ;;  %s805_s20 = sshll.u32 %s1185_s19, 4  ;;  %s796_s18 = int_to_ptr.vmem [resolvable:$true] %s795_s18  ;;  %s806_s20 = int_to_ptr.vmem [resolvable:$true] %s805_s20 }
  0x36   :  { %883 = vmatprep.subr.bf16.mxu0 %v1180_v0  ;;  %891 = vmatprep.subr.bf16.mxu1 %v1180_v0  ;;  %s1186_s21 = smov [#allocation12]   ;;  %s1104_s23 = scalar_lea.vmem %s796_s18, 128 }
  0x37   :  { %s782_s22 = sshll.u32 %s1186_s21, 4  ;;  %p1105_p6 = scmp.ne.s32.totalorder %s796_s18, %s1104_s23  ;;  %s1378_s22 = int_to_ptr.vmem [resolvable:$true] %s782_s22 }
  0x38   :  { %p1109_p7 = scmp.lt.s32.totalorder %s796_s18, %s796_s18  ;;  %p1110_p8 = scmp.lt.s32.totalorder %s1104_s23, %s1104_s23 }
  0x39   :  { %884 = vmatpush3.bf16.msra.mxu0 %v1249_v2  ;;  %892 = vmatpush3.bf16.msra.mxu1 %v1249_v2 }
  0x3a   :  { %897 = vmatprep.subr.bf16.mxu0 %v1180_v0  ;;  %905 = vmatprep.subr.bf16.mxu1 %v1180_v0  ;;  %p1111_p9 = por %p1110_p8, %p1109_p7 }
  0x3b   :  { %v87_v4 = vld [vmem:[#allocation2] sm:$0xff]  ;;  %v88_v15 = vld [vmem:[#allocation3] sm:$0xff] }
  0x3c   :  { %v91_v5 = vpack.c.bf16 %v87_v4, %v87_v4  ;;  %p1112_p10 = pnand %p1111_p9, %p1105_p6 }
  0x3e   :  { %886 = vmatmul.mubr.msk.bf16.vlgmr.msra.gmra.mxu0 %vm79_vm1, %v91_v5 }
  0x3f   :  { %898 = vmatpush3.bf16.msra.mxu0 %v1246_v1  ;;  %901 = vmatprep.mubr.msk.bf16.mxu0 %vm1181_vm0, %v1180_v0 }
  0x40   :  { %899 = vmatprep.subr.bf16.mxu0 %v1180_v0 }
  0x43   :  { %900 = vmatpush3.bf16.msra.mxu0 %v1249_v2 }
  0x44   :  { %913 = vmatprep.subr.bf16.mxu0 %v1180_v0 }
  0xfe   :  { %v142_v9 = vpop.f32.mrf.mxu0 }
  0xff   :  { %v148_v10 = vadd.f32 %v142_v9, %v90_v8 }
 0x100   :  { %v887_v11 = vpop.f32.mrf.mxu0 }
 0x101   :  { %960 = vtanh.f32 %v148_v10  ;;  %v826_v16 = vmul.f32 -1.442695, %v148_v10 }
 0x102   :  { %v145_v12 = vpop.f32.mrf.mxu0 }
 0x103   :  { %962 = vpow2.f32 %v826_v16 }
 0x104   :  { %v888_v13 = vpop.f32.mrf.mxu0 }
 0x105   :  { %v352_v13 = vunpack.c.h.bf16 %v269_v52 }
 0x10e   :  { %v961_v14 = vpop.eup %960 }
 0x10f   :  { %162 = vrot.lane.b32.xlu0 %v961_v14, %s1176_s26 }
 0x110   :  { %v963_v17 = vpop.eup %962 }
 0x111   :  { %v152_v18 = vadd.f32 1.0, %v963_v17 }
 0x113   :  { %157 = vrot.lane.b32.xlu0 %v88_v15, %s1182_s2  ;;  %964 = vrcp.f32 %v152_v18 }
 0x120   :  { %v965_v19 = vpop.eup %964 }
 0x181   :  { %v163_v20 = vpop.permute.xlu0 %162 }
 0x182   :  { %v165_v21 = vmul.f32 %v965_v19, %v163_v20 }
 0x184   :  { %167 = vrot.lane.b32.xlu1 %v165_v21, %s1182_s2 }
 0x185   :  { %v158_v22 = vpop.permute.xlu0 %157 }
 0x186   :  { %v160_v23 = vmul.f32 %v965_v19, %v158_v22 }
 0x1f6   :  { %v168_v24 = vpop.permute.xlu1 %167 }
 0x1f7   :  { %v170_v25 = vadd.f32 %v168_v24, %v160_v23 }
 0x1f9   :  { %966 = vtanh.f32 %v170_v25 }
 0x206   :  { %v967_v26 = vpop.eup %966 }
 0x207   :  { %173 = vrot.lane.b32.xlu1 %v967_v26, %s1176_s26 }
 0x279   :  { %v174_v27 = vpop.permute.xlu1 %173 }
 0x27a   :  { %v176_v28 = vmul.f32 %v965_v19, %v174_v27 }
 0x27c   :  { %v1271_v29 = vpack.c.bf16 %v176_v28, %v176_v28 }
 0x27e   :  { %189 = vrot.lane.b32.xlu0 %v1271_v29, %s1182_s2 }
 0x2f0   :  { %v190_v30 = vpop.permute.xlu0 %189 }
 0x2f1   :  { %894 = vmatmul.mubr.msk.bf16.vlgmr.msra.gmra.mxu1 %vm79_vm1, %v190_v30 }
 0x2f2   :  { %906 = vmatpush3.bf16.msra.mxu1 %v1246_v1  ;;  %909 = vmatprep.mubr.msk.bf16.mxu1 %vm1181_vm0, %v1180_v0 }
 0x2f3   :  { %907 = vmatprep.subr.bf16.mxu1 %v1180_v0 }
 0x2f6   :  { %908 = vmatpush3.bf16.msra.mxu1 %v1249_v2 }
 0x2f7   :  { %921 = vmatprep.subr.bf16.mxu1 %v1180_v0 }
 0x3b1   :  { %v228_v32 = vpop.f32.mrf.mxu1 }
 0x3b2   :  { %v234_v33 = vadd.f32 %v228_v32, %v188_v31 }
 0x3b3   :  { %v895_v34 = vpop.f32.mrf.mxu1 }
 0x3b4   :  { %968 = vtanh.f32 %v234_v33  ;;  %v829_v38 = vmul.f32 -1.442695, %v234_v33 }
 0x3b5   :  { %v231_v35 = vpop.f32.mrf.mxu1 }
 0x3b6   :  { %970 = vpow2.f32 %v829_v38  ;;  %v433_v35 = vld [vmem:[#allocation4 + $0x10] sm:$0xff]  }
 0x3b7   :  { %v896_v36 = vpop.f32.mrf.mxu1 }
 0x3b8   :  { %v434_v36 = vunpack.c.l.bf16 %v433_v35 }
 0x3c1   :  { %v969_v37 = vpop.eup %968 }
 0x3c2   :  { %244 = vrot.lane.b32.xlu1 %v969_v37, %s1176_s26 }
 0x3c3   :  { %v971_v39 = vpop.eup %970 }
 0x3c4   :  { %v238_v40 = vadd.f32 1.0, %v971_v39 }
 0x3c6   :  { %972 = vrcp.f32 %v238_v40 }
 0x3d3   :  { %v973_v41 = vpop.eup %972 }
 0x3d4   :  { %v242_v44 = vmul.f32 %v973_v41, %v170_v25 }
 0x434   :  { %v245_v42 = vpop.permute.xlu1 %244 }
 0x435   :  { %v247_v43 = vmul.f32 %v973_v41, %v245_v42 }
 0x437   :  { %249 = vrot.lane.b32.xlu0 %v247_v43, %s1182_s2 }
 0x4a9   :  { %v250_v45 = vpop.permute.xlu0 %249 }
 0x4aa   :  { %v252_v46 = vadd.f32 %v250_v45, %v242_v44 }
 0x4ac   :  { %974 = vtanh.f32 %v252_v46 }
 0x4b9   :  { %v975_v47 = vpop.eup %974 }
 0x4ba   :  { %255 = vrot.lane.b32.xlu1 %v975_v47, %s1176_s26 }
 0x52c   :  { %v256_v48 = vpop.permute.xlu1 %255 }
 0x52d   :  { %v258_v49 = vmul.f32 %v973_v41, %v256_v48 }
 0x52f   :  { %v1285_v50 = vpack.c.bf16 %v258_v49, %v258_v49 }
 0x531   :  { %271 = vrot.lane.b32.xlu0 %v1285_v50, %s1182_s2 }
 0x5a3   :  { %v272_v51 = vpop.permute.xlu0 %271 }
 0x5a4   :  { %902 = vmatmul.mubr.msk.bf16.vlgmr.msra.gmra.mxu0 %vm79_vm1, %v272_v51 }
 0x5a5   :  { %914 = vmatpush3.bf16.msra.mxu0 %v1246_v1  ;;  %917 = vmatprep.mubr.msk.bf16.mxu0 %vm1181_vm0, %v1180_v0 }
 0x5a6   :  { %915 = vmatprep.subr.bf16.mxu0 %v1180_v0 }
 0x5a9   :  { %916 = vmatpush3.bf16.msra.mxu0 %v1249_v2 }
 0x5aa   :  { %929 = vmatprep.subr.bf16.mxu0 %v1180_v0 }
 0x664   :  { %v310_v54 = vpop.f32.mrf.mxu0 }
 0x665   :  { %v316_v55 = vadd.f32 %v310_v54, %v270_v53 }
 0x666   :  { %v903_v56 = vpop.f32.mrf.mxu0 }
 0x667   :  { %976 = vtanh.f32 %v316_v55  ;;  %v832_v60 = vmul.f32 -1.442695, %v316_v55 }
 0x668   :  { %v313_v57 = vpop.f32.mrf.mxu0 }
 0x669   :  { %978 = vpow2.f32 %v832_v60 }
 0x66a   :  { %v904_v58 = vpop.f32.mrf.mxu0 }
 0x66b   :  { %v516_v58 = vunpack.c.h.bf16 %v433_v35 }
 0x674   :  { %v977_v59 = vpop.eup %976 }
 0x675   :  { %326 = vrot.lane.b32.xlu1 %v977_v59, %s1176_s26 }
 0x676   :  { %v979_v61 = vpop.eup %978 }
 0x677   :  { %v320_v62 = vadd.f32 1.0, %v979_v61 }
 0x679   :  { %980 = vrcp.f32 %v320_v62 }
 0x686   :  { %v981_v63 = vpop.eup %980 }
 0x687   :  { %v324_v5 = vmul.f32 %v981_v63, %v252_v46 }
 0x6e7   :  { %v327_v3 = vpop.permute.xlu1 %326 }
 0x6e8   :  { %v329_v4 = vmul.f32 %v981_v63, %v327_v3 }
 0x6ea   :  { %331 = vrot.lane.b32.xlu0 %v329_v4, %s1182_s2 }
 0x75c   :  { %v332_v6 = vpop.permute.xlu0 %331 }
 0x75d   :  { %v334_v7 = vadd.f32 %v332_v6, %v324_v5 }
 0x75f   :  { %982 = vtanh.f32 %v334_v7 }
 0x76c   :  { %v983_v8 = vpop.eup %982 }
 0x76d   :  { %337 = vrot.lane.b32.xlu1 %v983_v8, %s1176_s26 }
 0x7df   :  { %v338_v9 = vpop.permute.xlu1 %337 }
 0x7e0   :  { %v340_v10 = vmul.f32 %v981_v63, %v338_v9 }
 0x7e2   :  { %v1299_v11 = vpack.c.bf16 %v340_v10, %v340_v10 }
 0x7e4   :  { %353 = vrot.lane.b32.xlu0 %v1299_v11, %s1182_s2 }
 0x856   :  { %v354_v12 = vpop.permute.xlu0 %353 }
 0x857   :  { %910 = vmatmul.mubr.msk.bf16.vlgmr.msra.gmra.mxu1 %vm79_vm1, %v354_v12 }
 0x858   :  { %922 = vmatpush3.bf16.msra.mxu1 %v1246_v1  ;;  %925 = vmatprep.mubr.msk.bf16.mxu1 %vm1181_vm0, %v1180_v0 }
 0x859   :  { %923 = vmatprep.subr.bf16.mxu1 %v1180_v0 }
 0x85c   :  { %924 = vmatpush3.bf16.msra.mxu1 %v1249_v2 }
 0x85d   :  { %937 = vmatprep.subr.bf16.mxu1 %v1180_v0 }
 0x917   :  { %v392_v14 = vpop.f32.mrf.mxu1 }
 0x918   :  { %v398_v15 = vadd.f32 %v392_v14, %v352_v13 }
 0x919   :  { %v911_v16 = vpop.f32.mrf.mxu1 }
 0x91a   :  { %984 = vtanh.f32 %v398_v15  ;;  %v835_v20 = vmul.f32 -1.442695, %v398_v15  ;;  %v597_v16 = vld [vmem:[#allocation4 + $0x18] sm:$0xff]  }
 0x91b   :  { %v395_v17 = vpop.f32.mrf.mxu1 }
 0x91c   :  { %986 = vpow2.f32 %v835_v20  ;;  %v598_v17 = vunpack.c.l.bf16 %v597_v16 }
 0x91d   :  { %v912_v18 = vpop.f32.mrf.mxu1 }
 0x927   :  { %v985_v19 = vpop.eup %984 }
 0x928   :  { %408 = vrot.lane.b32.xlu1 %v985_v19, %s1176_s26 }
 0x929   :  { %v987_v21 = vpop.eup %986 }
 0x92a   :  { %v402_v22 = vadd.f32 1.0, %v987_v21 }
 0x92c   :  { %988 = vrcp.f32 %v402_v22 }
 0x939   :  { %v989_v23 = vpop.eup %988 }
 0x93a   :  { %v406_v26 = vmul.f32 %v989_v23, %v334_v7 }
 0x99a   :  { %v409_v24 = vpop.permute.xlu1 %408 }
 0x99b   :  { %v411_v25 = vmul.f32 %v989_v23, %v409_v24 }
 0x99d   :  { %413 = vrot.lane.b32.xlu0 %v411_v25, %s1182_s2 }
 0xa0f   :  { %v414_v27 = vpop.permute.xlu0 %413 }
 0xa10   :  { %v416_v28 = vadd.f32 %v414_v27, %v406_v26 }
 0xa12   :  { %990 = vtanh.f32 %v416_v28 }
 0xa1f   :  { %v991_v30 = vpop.eup %990 }
 0xa20   :  { %419 = vrot.lane.b32.xlu1 %v991_v30, %s1176_s26 }
 0xa92   :  { %v420_v31 = vpop.permute.xlu1 %419 }
 0xa93   :  { %v422_v32 = vmul.f32 %v989_v23, %v420_v31 }
 0xa95   :  { %v1313_v33 = vpack.c.bf16 %v422_v32, %v422_v32 }
 0xa97   :  { %435 = vrot.lane.b32.xlu0 %v1313_v33, %s1182_s2 }
 0xb09   :  { %v436_v34 = vpop.permute.xlu0 %435 }
 0xb0a   :  { %918 = vmatmul.mubr.msk.bf16.vlgmr.msra.gmra.mxu0 %vm79_vm1, %v436_v34 }
 0xb0b   :  { %930 = vmatpush3.bf16.msra.mxu0 %v1246_v1  ;;  %933 = vmatprep.mubr.msk.bf16.mxu0 %vm1181_vm0, %v1180_v0 }
 0xb0c   :  { %931 = vmatprep.subr.bf16.mxu0 %v1180_v0 }
 0xb0f   :  { %932 = vmatpush3.bf16.msra.mxu0 %v1249_v2 }
 0xbca   :  { %v474_v37 = vpop.f32.mrf.mxu0 }
 0xbcb   :  { %v480_v38 = vadd.f32 %v474_v37, %v434_v36 }
 0xbcc   :  { %v919_v39 = vpop.f32.mrf.mxu0 }
 0xbcd   :  { %992 = vtanh.f32 %v480_v38  ;;  %v838_v43 = vmul.f32 -1.442695, %v480_v38 }
 0xbce   :  { %v477_v40 = vpop.f32.mrf.mxu0 }
 0xbcf   :  { %994 = vpow2.f32 %v838_v43  ;;  %v680_v40 = vunpack.c.h.bf16 %v597_v16 }
 0xbd0   :  { %v920_v41 = vpop.f32.mrf.mxu0 }
 0xbda   :  { %v993_v42 = vpop.eup %992 }
 0xbdb   :  { %490 = vrot.lane.b32.xlu1 %v993_v42, %s1176_s26 }
 0xbdc   :  { %v995_v44 = vpop.eup %994 }
 0xbdd   :  { %v484_v45 = vadd.f32 1.0, %v995_v44 }
 0xbdf   :  { %996 = vrcp.f32 %v484_v45 }
 0xbec   :  { %v997_v46 = vpop.eup %996 }
 0xbed   :  { %v488_v49 = vmul.f32 %v997_v46, %v416_v28 }
 0xc4d   :  { %v491_v47 = vpop.permute.xlu1 %490 }
 0xc4e   :  { %v493_v48 = vmul.f32 %v997_v46, %v491_v47 }
 0xc50   :  { %495 = vrot.lane.b32.xlu0 %v493_v48, %s1182_s2 }
 0xcc2   :  { %v496_v51 = vpop.permute.xlu0 %495 }
 0xcc3   :  { %v498_v52 = vadd.f32 %v496_v51, %v488_v49 }
 0xcc5   :  { %998 = vtanh.f32 %v498_v52 }
 0xcd2   :  { %v999_v53 = vpop.eup %998 }
 0xcd3   :  { %501 = vrot.lane.b32.xlu1 %v999_v53, %s1176_s26 }
 0xd45   :  { %v502_v54 = vpop.permute.xlu1 %501 }
 0xd46   :  { %v504_v55 = vmul.f32 %v997_v46, %v502_v54 }
 0xd48   :  { %v1326_v56 = vpack.c.bf16 %v504_v55, %v504_v55 }
 0xd4a   :  { %517 = vrot.lane.b32.xlu0 %v1326_v56, %s1182_s2 }
 0xdbc   :  { %v518_v57 = vpop.permute.xlu0 %517 }
 0xdbd   :  { %926 = vmatmul.mubr.msk.bf16.vlgmr.msra.gmra.mxu1 %vm79_vm1, %v518_v57 }
 0xdbe   :  { %938 = vmatpush3.bf16.msra.mxu1 %v1246_v1  ;;  %941 = vmatprep.mubr.msk.bf16.mxu1 %vm1181_vm0, %v1180_v0 }
 0xdbf   :  { %939 = vmatprep.subr.bf16.mxu1 %v1180_v0 }
 0xdc2   :  { %940 = vmatpush3.bf16.msra.mxu1 %v1249_v2 }
 0xe7d   :  { %v556_v59 = vpop.f32.mrf.mxu1 }
 0xe7e   :  { %v562_v60 = vadd.f32 %v556_v59, %v516_v58 }
 0xe7f   :  { %v927_v61 = vpop.f32.mrf.mxu1 }
 0xe80   :  { %1000 = vtanh.f32 %v562_v60  ;;  %v841_v4 = vmul.f32 -1.442695, %v562_v60 }
 0xe81   :  { %v559_v62 = vpop.f32.mrf.mxu1 }
 0xe82   :  { %1002 = vpow2.f32 %v841_v4 }
 0xe83   :  { %v928_v63 = vpop.f32.mrf.mxu1 }
 0xe8d   :  { %v1001_v3 = vpop.eup %1000 }
 0xe8e   :  { %572 = vrot.lane.b32.xlu1 %v1001_v3, %s1176_s26 }
 0xe8f   :  { %v1003_v1 = vpop.eup %1002 }
 0xe90   :  { %v566_v5 = vadd.f32 1.0, %v1003_v1 }
 0xe92   :  { %1004 = vrcp.f32 %v566_v5 }
 0xe9f   :  { %v1005_v6 = vpop.eup %1004 }
 0xea0   :  { %v570_v2 = vmul.f32 %v1005_v6, %v498_v52 }
 0xf00   :  { %v573_v7 = vpop.permute.xlu1 %572 }
 0xf01   :  { %v575_v0 = vmul.f32 %v1005_v6, %v573_v7 }
 0xf03   :  { %577 = vrot.lane.b32.xlu0 %v575_v0, %s1182_s2 }
 0xf75   :  { %v578_v8 = vpop.permute.xlu0 %577 }
 0xf76   :  { %v580_v9 = vadd.f32 %v578_v8, %v570_v2 }
 0xf78   :  { %1006 = vtanh.f32 %v580_v9 }
 0xf85   :  { %v1007_v10 = vpop.eup %1006 }
 0xf86   :  { %583 = vrot.lane.b32.xlu1 %v1007_v10, %s1176_s26 }
 0xff8   :  { %v584_v12 = vpop.permute.xlu1 %583 }
 0xff9   :  { %v586_v13 = vmul.f32 %v1005_v6, %v584_v12 }
 0xffb   :  { %v1339_v14 = vpack.c.bf16 %v586_v13, %v586_v13 }
 0xffd   :  { %599 = vrot.lane.b32.xlu0 %v1339_v14, %s1182_s2 }
0x106f   :  { %v600_v15 = vpop.permute.xlu0 %599 }
0x1070   :  { %934 = vmatmul.mubr.msk.bf16.vlgmr.msra.gmra.mxu0 %vm79_vm1, %v600_v15 }
0x1130   :  { %v638_v18 = vpop.f32.mrf.mxu0 }
0x1131   :  { %v644_v19 = vadd.f32 %v638_v18, %v598_v17 }
0x1132   :  { %v935_v20 = vpop.f32.mrf.mxu0 }
0x1133   :  { %1008 = vtanh.f32 %v644_v19  ;;  %v844_v24 = vmul.f32 -1.442695, %v644_v19 }
0x1134   :  { %v641_v21 = vpop.f32.mrf.mxu0 }
0x1135   :  { %1010 = vpow2.f32 %v844_v24 }
0x1136   :  { %v936_v22 = vpop.f32.mrf.mxu0 }
0x1140   :  { %v1009_v23 = vpop.eup %1008 }
0x1141   :  { %654 = vrot.lane.b32.xlu1 %v1009_v23, %s1176_s26 }
0x1142   :  { %v1011_v25 = vpop.eup %1010 }
0x1143   :  { %v648_v26 = vadd.f32 1.0, %v1011_v25 }
0x1145   :  { %1012 = vrcp.f32 %v648_v26 }
0x1152   :  { %v1013_v27 = vpop.eup %1012 }
0x1153   :  { %v652_v31 = vmul.f32 %v1013_v27, %v580_v9 }
0x11b3   :  { %v655_v28 = vpop.permute.xlu1 %654 }
0x11b4   :  { %v657_v30 = vmul.f32 %v1013_v27, %v655_v28 }
0x11b6   :  { %659 = vrot.lane.b32.xlu0 %v657_v30, %s1182_s2 }
0x1228   :  { %v660_v32 = vpop.permute.xlu0 %659 }
0x1229   :  { %v662_v34 = vadd.f32 %v660_v32, %v652_v31 }
0x122b   :  { %1014 = vtanh.f32 %v662_v34 }
0x1238   :  { %v1015_v35 = vpop.eup %1014 }
0x1239   :  { %665 = vrot.lane.b32.xlu1 %v1015_v35, %s1176_s26 }
0x12ab   :  { %v666_v36 = vpop.permute.xlu1 %665 }
0x12ac   :  { %v668_v37 = vmul.f32 %v1013_v27, %v666_v36 }
0x12ae   :  { %v669_v38 = vpack.c.bf16 %v668_v37, %v668_v37 }
0x12b0   :  { %681 = vrot.lane.b32.xlu0 %v669_v38, %s1182_s2 }
0x1322   :  { %v682_v39 = vpop.permute.xlu0 %681 }
0x1323   :  { %942 = vmatmul.mubr.msk.bf16.vlgmr.msra.gmra.mxu1 %vm79_vm1, %v682_v39 }
0x13e3   :  { %v720_v41 = vpop.f32.mrf.mxu1 }
0x13e4   :  { %v726_v42 = vadd.f32 %v720_v41, %v680_v40 }
0x13e5   :  { %v943_v43 = vpop.f32.mrf.mxu1 }
0x13e6   :  { %1016 = vtanh.f32 %v726_v42  ;;  %v847_v47 = vmul.f32 -1.442695, %v726_v42 }
0x13e7   :  { %v723_v44 = vpop.f32.mrf.mxu1 }
0x13e8   :  { %1018 = vpow2.f32 %v847_v47 }
0x13e9   :  { %v944_v45 = vpop.f32.mrf.mxu1 }
0x13f3   :  { %v1017_v46 = vpop.eup %1016 }
0x13f4   :  { %736 = vrot.lane.b32.xlu1 %v1017_v46, %s1176_s26 }
0x13f5   :  { %v1019_v48 = vpop.eup %1018 }
0x13f6   :  { %v730_v49 = vadd.f32 1.0, %v1019_v48 }
0x13f8   :  { %1020 = vrcp.f32 %v730_v49 }
0x1405   :  { %v1021_v51 = vpop.eup %1020 }
0x1406   :  { %v734_v54 = vmul.f32 %v1021_v51, %v662_v34 }
0x1466   :  { %v737_v52 = vpop.permute.xlu1 %736 }
0x1467   :  { %v739_v53 = vmul.f32 %v1021_v51, %v737_v52 }
0x1469   :  { %741 = vrot.lane.b32.xlu0 %v739_v53, %s1182_s2 }
0x146d   :  { %181 = vrot.lane.b32.xlu0 %v1271_v29, %s1182_s2 }
0x14db   :  { %v742_v55 = vpop.permute.xlu0 %741 }
0x14dc   :  { %v744_v57 = vadd.f32 %v742_v55, %v734_v54 }
0x14de   :  { %1022 = vtanh.f32 %v744_v57 }
0x14df   :  { %v182_v58 = vpop.permute.xlu0 %181 }
0x14e0   :  { %185 = vst.msk [vmem:[#allocation12] sm:$0xf] %vm184_vm2, %v182_v58 }
0x14eb   :  { %v1023_v59 = vpop.eup %1022 }
0x14ec   :  { %747 = vrot.lane.b32.xlu1 %v1023_v59, %s1176_s26 }
0x14f0   :  { %766 = vrot.lane.b32.xlu1 %v744_v57, %s1183_s3 }
0x14f4   :  { %263 = vrot.lane.b32.xlu1 %v1285_v50, %s1182_s2 }
0x14f8   :  { %427 = vrot.lane.b32.xlu1 %v1313_v33, %s1182_s2 }
0x14fc   :  { %591 = vrot.lane.b32.xlu1 %v1339_v14, %s1182_s2 }
0x155e   :  { %v748_v29 = vpop.permute.xlu1 %747 }
0x155f   :  { %v750_v60 = vmul.f32 %v1021_v51, %v748_v29 }
0x1561   :  { %v856_v61 = vpack.c.bf16 %v750_v60, %v750_v60  ;;  %761 = vrot.lane.b32.xlu0 %v750_v60, %s1182_s2 }
0x1562   :  { %v767_v62 = vpop.permute.xlu1 %766 }
0x1563   :  { %769 = vst.msk [vmem:[#allocation3] sm:$0xff] %vm79_vm1, %v767_v62  ;;  %755 = vrot.lane.b32.xlu1 %v856_v61, %s1182_s2 }
0x1565   :  { %345 = vrot.lane.b32.xlu0 %v1299_v11, %s1182_s2 }
0x1566   :  { %v264_v50 = vpop.permute.xlu1 %263 }
0x1567   :  { %267 = vst.msk [vmem:[#allocation12 + $0x4] sm:$0xf] %vm184_vm2, %v264_v50 }
0x1569   :  { %509 = vrot.lane.b32.xlu0 %v1326_v56, %s1182_s2 }
0x156a   :  { %v428_v33 = vpop.permute.xlu1 %427  ;;  %v775_v63 = vld [vmem:[#allocation3] sm:$0xff] }
0x156b   :  { %431 = vst.msk [vmem:[#allocation12 + $0xc] sm:$0xf] %vm184_vm2, %v428_v33 }
0x156c   :  { %776 = vst.msk [vmem:[#allocation15] sm:$0xff] %vm79_vm1, %v775_v63 }
0x156d   :  { %673 = vrot.lane.b32.xlu0 %v669_v38, %s1182_s2 }
0x156e   :  { %v592_v3 = vpop.permute.xlu1 %591 }
0x156f   :  { %595 = vst.msk [vmem:[#allocation12 + $0x14] sm:$0xf] %vm184_vm2, %v592_v3 }
0x15d3   :  { %v762_v4 = vpop.permute.xlu0 %761 }
0x15d4   :  { %764 = vst.msk [vmem:[#allocation2] sm:$0xff] %vm79_vm1, %v762_v4 }
0x15d5   :  { %v756_v11 = vpop.permute.xlu1 %755 }
0x15d6   :  { %759 = vst.msk [vmem:[#allocation12 + $0x1c] sm:$0xf] %vm184_vm2, %v756_v11 }
0x15d7   :  { %v346_v1 = vpop.permute.xlu0 %345 }
0x15d8   :  { %349 = vst.msk [vmem:[#allocation12 + $0x8] sm:$0xf] %vm184_vm2, %v346_v1 }
0x15db   :  { %v510_v56 = vpop.permute.xlu0 %509  ;;  %v773_v5 = vld [vmem:[#allocation2] sm:$0xff] }
0x15dc   :  { %513 = vst.msk [vmem:[#allocation12 + $0x10] sm:$0xf] %vm184_vm2, %v510_v56 }
0x15dd   :  { %774 = vst.msk [vmem:[#allocation13] sm:$0xff] %vm79_vm1, %v773_v5 }
0x15de   :  { %1115 = shalt.err (!%p1112_p10)
}
0x15df   :  { %798 = dma.vmem_to_hbm [thread:$0]  %s796_s18, 128, %s1403_s5, [#allocation14]  }
0x15e0   :  { %s1124_s28 = scalar_lea.vmem %s806_s20, 128  ;;  %p1129_p12 = scmp.lt.s32.totalorder %s806_s20, %s806_s20 }
0x15e1   :  { %p1125_p11 = scmp.ne.s32.totalorder %s806_s20, %s1124_s28  ;;  %p1130_p13 = scmp.lt.s32.totalorder %s1124_s28, %s1124_s28 }
0x15e3   :  { %p1131_p0 = por %p1130_p13, %p1129_p12 }
0x15e5   :  { %p1132_p1 = pnand %p1131_p0, %p1125_p11 }
0x15e7   :  { %1135 = shalt.err (!%p1132_p1)
}
0x15e8   :  { %808 = dma.vmem_to_hbm [thread:$0]  %s806_s20, 128, %s1404_s6, [#allocation14]   ;;  %v674_v6 = vpop.permute.xlu0 %673 }
0x15e9   :  { %677 = vst.msk [vmem:[#allocation12 + $0x18] sm:$0xf] %vm184_vm2, %v674_v6  ;;  %s1144_s7 = scalar_lea.vmem %s1378_s22, 512  ;;  %p1149_p3 = scmp.lt.s32.totalorder %s1378_s22, %s1378_s22 }
0x15ea   :  { %p1145_p2 = scmp.ne.s32.totalorder %s1378_s22, %s1144_s7  ;;  %p1150_p4 = scmp.lt.s32.totalorder %s1144_s7, %s1144_s7 }
0x15ec   :  { %p1151_p5 = por %p1150_p4, %p1149_p3 }
0x15ee   :  { %p1152_p6 = pnand %p1151_p5, %p1145_p2 }
0x15f0   :  { %1155 = shalt.err (!%p1152_p6)
}
0x15f1   :  { %788 = dma.vmem_to_hbm [thread:$0]  %s1378_s22, 512, %s1402_s4, [#allocation6], %s1176_s26, %s1176_s26, %s1177_s27  }
0x15f2   :  { %1170 = dma.done.wait [#allocation6], 512  }
0x15f3   :  { %1171 = vsyncadd [#allocation6], 4294966784 }
0x15f4   :  { %1172 = dma.done.wait [#allocation14], 256  }
0x15f5   :  { %1173 = vsyncadd [#allocation14], 4294967040 }
0x15f6   :  { %818 = vsyncpa [#allocation5], 1 }
0x15f7   :  { %819 = vsyncpa [#allocation8], 1 }
0x15f8   :  { %820 = vsyncpa [#allocation11], 1 }
0x15f9   :  { %821 = vsyncpa [#allocation6], 1 }
0x15fa   :  { %822 = vsyncpa [#allocation14], 1 }

</bundles_post_ra>
